<compile_context>
chip_gen: v7x
topology: tpu7x:2x2x1
jax: 0.10.0
libtpu: 0.0.40
codegen_flags: <defaults>
</compile_context>

<pallas_src>
import functools
import math

import jax
import jax.numpy as jnp
from jax.experimental import pallas as pl
from jax.experimental.pallas import tpu as pltpu

HIDDEN_DIM = 32
INPUT_DIM = 1
NUM_LAYERS = 2
OUTPUT_DIM = 1


def lstm_kernel(x_ref,                      # (T*B, I)   time-major rows
                wih0_ref, whh0_ref, b0_ref,  # (I, 4H), (H, 4H), (1, 4H)
                wih1_ref, whh1_ref, b1_ref,  # (H, 4H), (H, 4H), (1, 4H)
                wfc_ref, bfc_ref,            # (H, O), (1, O)
                out_ref,                     # (B, O)
                h0_seq_ref,                  # VMEM scratch (T*B, H)
                *, T, B):
    H = whh0_ref.shape[0]

    whh0 = whh0_ref[...]
    whh1 = whh1_ref[...]

    # ---- Layer-0 input projection + bias for ALL timesteps (no MXU, K=1) ----
    # (T*B, 1) * (1, 4H) + (1, 4H) -> (T*B, 4H)
    xproj0 = x_ref[...] * wih0_ref[...] + b0_ref[...]

    def cell(pre, h, c, whh):
        # pre already contains x-projection + both biases.
        g = pre + jnp.dot(h, whh, preferred_element_type=jnp.float32)
        sg = jax.nn.sigmoid(g)               # full 128-lane EUP op
        tg = jnp.tanh(g)                     # full 128-lane EUP op
        i = sg[:, 0 * H:1 * H]
        f = sg[:, 1 * H:2 * H]
        gg = tg[:, 2 * H:3 * H]
        o = sg[:, 3 * H:4 * H]
        c_new = f * c + i * gg
        h_new = o * jnp.tanh(c_new)
        return h_new, c_new

    zeros = jnp.zeros((B, H), dtype=jnp.float32)

    # ---- Layer-0 recurrence (fully unrolled, one matmul per step) ----
    h0, c0 = zeros, zeros
    for t in range(T):
        h0, c0 = cell(xproj0[t * B:(t + 1) * B, :], h0, c0, whh0)
        h0_seq_ref[t * B:(t + 1) * B, :] = h0

    # ---- Layer-1 input projection for all timesteps: ONE batched matmul ----
    xproj1 = (jnp.dot(h0_seq_ref[...], wih1_ref[...],
                      preferred_element_type=jnp.float32)
              + b1_ref[...])                 # (T*B, 4H)

    # ---- Layer-1 recurrence (fully unrolled, one matmul per step) ----
    h1, c1 = zeros, zeros
    for t in range(T):
        h1, c1 = cell(xproj1[t * B:(t + 1) * B, :], h1, c1, whh1)

    # ---- Final Linear on the last hidden state ----
    out_ref[...] = (jnp.dot(h1, wfc_ref[...], preferred_element_type=jnp.float32)
                    + bfc_ref[...]).astype(out_ref.dtype)


def lstm_forward(x, params):
    """x: (B, T, I) float32 (batch_first, like PyTorch). Returns (B, OUTPUT_DIM)."""
    B, T, I = x.shape
    # time-major rows: row t*B + b corresponds to (batch b, time t)
    x2d = jnp.transpose(x, (1, 0, 2)).reshape(T * B, I)

    (wih0, whh0, bih0, bhh0,
     wih1, whh1, bih1, bhh1,
     wfc, bfc) = params

    H = HIDDEN_DIM
    args = (
        x2d,
        wih0.T, whh0.T, (bih0 + bhh0).reshape(1, 4 * H),
        wih1.T, whh1.T, (bih1 + bhh1).reshape(1, 4 * H),
        wfc.T, bfc.reshape(1, OUTPUT_DIM),
    )

    vmem = pl.BlockSpec(memory_space=pltpu.MemorySpace.VMEM)
    out = pl.pallas_call(
        functools.partial(lstm_kernel, T=T, B=B),
        out_shape=jax.ShapeDtypeStruct((B, OUTPUT_DIM), jnp.float32),
        in_specs=[vmem] * len(args),
        out_specs=vmem,
        scratch_shapes=[pltpu.VMEM((T * B, H), jnp.float32)],
    )(*args)
    return out


def init_params(key):
    """Deterministic init matching PyTorch nn.LSTM / nn.Linear shapes."""
    H, I, O = HIDDEN_DIM, INPUT_DIM, OUTPUT_DIM
    bound_lstm = 1.0 / math.sqrt(H)
    bound_fc = 1.0 / math.sqrt(H)
    keys = jax.random.split(key, 10)
    u = lambda k, shape, b: jax.random.uniform(k, shape, jnp.float32, -b, b)
    wih0 = u(keys[0], (4 * H, I), bound_lstm)
    whh0 = u(keys[1], (4 * H, H), bound_lstm)
    bih0 = u(keys[2], (4 * H,), bound_lstm)
    bhh0 = u(keys[3], (4 * H,), bound_lstm)
    wih1 = u(keys[4], (4 * H, H), bound_lstm)
    whh1 = u(keys[5], (4 * H, H), bound_lstm)
    bih1 = u(keys[6], (4 * H,), bound_lstm)
    bhh1 = u(keys[7], (4 * H,), bound_lstm)
    wfc = u(keys[8], (O, H), bound_fc)
    bfc = u(keys[9], (O,), bound_fc)
    return (wih0, whh0, bih0, bhh0, wih1, whh1, bih1, bhh1, wfc, bfc)


def lstm_reference(x, params):
    """Pure-JAX reference with identical semantics (for correctness check)."""
    (wih0, whh0, bih0, bhh0, wih1, whh1, bih1, bhh1, wfc, bfc) = params
    B, T, I = x.shape
    H = HIDDEN_DIM

    def cell(x_t, h, c, wih, whh, bih, bhh):
        g = x_t @ wih.T + bih + h @ whh.T + bhh
        i = jax.nn.sigmoid(g[:, :H])
        f = jax.nn.sigmoid(g[:, H:2 * H])
        gg = jnp.tanh(g[:, 2 * H:3 * H])
        o = jax.nn.sigmoid(g[:, 3 * H:])
        c = f * c + i * gg
        h = o * jnp.tanh(c)
        return h, c

    h0 = c0 = h1 = c1 = jnp.zeros((B, H), jnp.float32)
    for t in range(T):
        h0, c0 = cell(x[:, t, :], h0, c0, wih0, whh0, bih0, bhh0)
        h1, c1 = cell(h0, h1, c1, wih1, whh1, bih1, bhh1)
    return h1 @ wfc.T + bfc


if __name__ == "__main__":
    key = jax.random.PRNGKey(0)
    k_x, k_p = jax.random.split(key)

    B, T = 2, 8
    x = jax.random.normal(k_x, (B, T, INPUT_DIM), dtype=jnp.float32)
    params = init_params(k_p)

    out = lstm_forward(x, params)
    out = jax.block_until_ready(out)

    ref = lstm_reference(x, params)
    assert out.shape == (B, OUTPUT_DIM)
    assert jnp.allclose(out, ref, atol=1e-5, rtol=1e-5), (out, ref)

    print("KERNEL_OK")
</pallas_src>

<mosaic_0001>
module attributes {stable_mosaic.version = 11 : i64} {
  func.func @lstm_kernel(%arg0: memref<16x1xf32, #tpu.memory_space<vmem>>, %arg1: memref<1x128xf32, #tpu.memory_space<vmem>>, %arg2: memref<32x128xf32, #tpu.memory_space<vmem>>, %arg3: memref<1x128xf32, #tpu.memory_space<vmem>>, %arg4: memref<32x128xf32, #tpu.memory_space<vmem>>, %arg5: memref<32x128xf32, #tpu.memory_space<vmem>>, %arg6: memref<1x128xf32, #tpu.memory_space<vmem>>, %arg7: memref<32x1xf32, #tpu.memory_space<vmem>>, %arg8: memref<1x1xf32, #tpu.memory_space<vmem>>, %arg9: memref<2x1xf32, #tpu.memory_space<vmem>>, %arg10: memref<16x32xf32, #tpu.memory_space<vmem>>) attributes {dimension_semantics = [], scalar_prefetch = 0 : i64, scratch_operands = 1 : i64, tpu.core_type = #tpu.core_type<tc>} {
    %c0 = arith.constant 0 : index
    %c0_0 = arith.constant 0 : index
    %0 = vector.load %arg2[%c0, %c0_0] : memref<32x128xf32, #tpu.memory_space<vmem>>, vector<32x128xf32>
    %c0_1 = arith.constant 0 : index
    %c0_2 = arith.constant 0 : index
    %1 = vector.load %arg5[%c0_1, %c0_2] : memref<32x128xf32, #tpu.memory_space<vmem>>, vector<32x128xf32>
    %c0_3 = arith.constant 0 : index
    %c0_4 = arith.constant 0 : index
    %2 = vector.load %arg0[%c0_3, %c0_4] : memref<16x1xf32, #tpu.memory_space<vmem>>, vector<16x1xf32>
    %c0_5 = arith.constant 0 : index
    %c0_6 = arith.constant 0 : index
    %3 = vector.load %arg1[%c0_5, %c0_6] : memref<1x128xf32, #tpu.memory_space<vmem>>, vector<1x128xf32>
    %4 = vector.broadcast %2 : vector<16x1xf32> to vector<16x128xf32>
    %5 = vector.broadcast %3 : vector<1x128xf32> to vector<16x128xf32>
    %6 = arith.mulf %4, %5 : vector<16x128xf32>
    %c0_7 = arith.constant 0 : index
    %c0_8 = arith.constant 0 : index
    %7 = vector.load %arg3[%c0_7, %c0_8] : memref<1x128xf32, #tpu.memory_space<vmem>>, vector<1x128xf32>
    %8 = vector.broadcast %7 : vector<1x128xf32> to vector<16x128xf32>
    %9 = arith.addf %6, %8 : vector<16x128xf32>
    %cst = arith.constant 0.000000e+00 : f32
    %10 = vector.broadcast %cst : f32 to vector<2x32xf32>
    %11 = vector.extract_strided_slice %9 {offsets = [0, 0], sizes = [2, 128], strides = [1, 1]} : vector<16x128xf32> to vector<2x128xf32>
    %cst_9 = arith.constant dense<0.000000e+00> : vector<2x128xf32>
    %12 = tpu.matmul %10, %0, %cst_9 {dimension_numbers = #tpu.dot_dimension_numbers<[1], [0], [0], [1], [0, 0, 1, 1], [], []>} : vector<2x32xf32>, vector<32x128xf32>, vector<2x128xf32> -> vector<2x128xf32>
    %13 = arith.addf %11, %12 : vector<2x128xf32>
    %14 = arith.negf %13 : vector<2x128xf32>
    %15 = math.exp %14 : vector<2x128xf32>
    %cst_10 = arith.constant 1.000000e+00 : f32
    %16 = vector.broadcast %cst_10 : f32 to vector<2x128xf32>
    %17 = arith.addf %16, %15 : vector<2x128xf32>
    %18 = arith.divf %16, %17 : vector<2x128xf32>
    %19 = math.tanh %13 : vector<2x128xf32>
    %20 = vector.extract_strided_slice %18 {offsets = [0, 0], sizes = [2, 32], strides = [1, 1]} : vector<2x128xf32> to vector<2x32xf32>
    %21 = vector.extract_strided_slice %18 {offsets = [0, 32], sizes = [2, 32], strides = [1, 1]} : vector<2x128xf32> to vector<2x32xf32>
    %22 = vector.extract_strided_slice %19 {offsets = [0, 64], sizes = [2, 32], strides = [1, 1]} : vector<2x128xf32> to vector<2x32xf32>
    %23 = vector.extract_strided_slice %18 {offsets = [0, 96], sizes = [2, 32], strides = [1, 1]} : vector<2x128xf32> to vector<2x32xf32>
    %24 = arith.mulf %21, %10 : vector<2x32xf32>
    %25 = arith.mulf %20, %22 : vector<2x32xf32>
    %26 = arith.addf %24, %25 : vector<2x32xf32>
    %27 = math.tanh %26 : vector<2x32xf32>
    %28 = arith.mulf %23, %27 : vector<2x32xf32>
    %c0_11 = arith.constant 0 : index
    %c0_12 = arith.constant 0 : index
    %29 = vector.load %arg10[%c0_11, %c0_12] : memref<16x32xf32, #tpu.memory_space<vmem>>, vector<2x32xf32>
    tpu.vector_store %arg10[%c0_11, %c0_12], %28 {strides = array<i32>} : memref<16x32xf32, #tpu.memory_space<vmem>>, vector<2x32xf32>,
    %30 = vector.extract_strided_slice %9 {offsets = [2, 0], sizes = [2, 128], strides = [1, 1]} : vector<16x128xf32> to vector<2x128xf32>
    %cst_13 = arith.constant dense<0.000000e+00> : vector<2x128xf32>
    %31 = tpu.matmul %28, %0, %cst_13 {dimension_numbers = #tpu.dot_dimension_numbers<[1], [0], [0], [1], [0, 0, 1, 1], [], []>} : vector<2x32xf32>, vector<32x128xf32>, vector<2x128xf32> -> vector<2x128xf32>
    %32 = arith.addf %30, %31 : vector<2x128xf32>
    %33 = arith.negf %32 : vector<2x128xf32>
    %34 = math.exp %33 : vector<2x128xf32>
    %cst_14 = arith.constant 1.000000e+00 : f32
    %35 = vector.broadcast %cst_14 : f32 to vector<2x128xf32>
    %36 = arith.addf %35, %34 : vector<2x128xf32>
    %37 = arith.divf %35, %36 : vector<2x128xf32>
    %38 = math.tanh %32 : vector<2x128xf32>
    %39 = vector.extract_strided_slice %37 {offsets = [0, 0], sizes = [2, 32], strides = [1, 1]} : vector<2x128xf32> to vector<2x32xf32>
    %40 = vector.extract_strided_slice %37 {offsets = [0, 32], sizes = [2, 32], strides = [1, 1]} : vector<2x128xf32> to vector<2x32xf32>
    %41 = vector.extract_strided_slice %38 {offsets = [0, 64], sizes = [2, 32], strides = [1, 1]} : vector<2x128xf32> to vector<2x32xf32>
    %42 = vector.extract_strided_slice %37 {offsets = [0, 96], sizes = [2, 32], strides = [1, 1]} : vector<2x128xf32> to vector<2x32xf32>
    %43 = arith.mulf %40, %26 : vector<2x32xf32>
    %44 = arith.mulf %39, %41 : vector<2x32xf32>
    %45 = arith.addf %43, %44 : vector<2x32xf32>
    %46 = math.tanh %45 : vector<2x32xf32>
    %47 = arith.mulf %42, %46 : vector<2x32xf32>
    %c2 = arith.constant 2 : index
    %c0_15 = arith.constant 0 : index
    %48 = vector.load %arg10[%c2, %c0_15] : memref<16x32xf32, #tpu.memory_space<vmem>>, vector<2x32xf32>
    tpu.vector_store %arg10[%c2, %c0_15], %47 {strides = array<i32>} : memref<16x32xf32, #tpu.memory_space<vmem>>, vector<2x32xf32>,
    %49 = vector.extract_strided_slice %9 {offsets = [4, 0], sizes = [2, 128], strides = [1, 1]} : vector<16x128xf32> to vector<2x128xf32>
    %cst_16 = arith.constant dense<0.000000e+00> : vector<2x128xf32>
    %50 = tpu.matmul %47, %0, %cst_16 {dimension_numbers = #tpu.dot_dimension_numbers<[1], [0], [0], [1], [0, 0, 1, 1], [], []>} : vector<2x32xf32>, vector<32x128xf32>, vector<2x128xf32> -> vector<2x128xf32>
    %51 = arith.addf %49, %50 : vector<2x128xf32>
    %52 = arith.negf %51 : vector<2x128xf32>
    %53 = math.exp %52 : vector<2x128xf32>
    %cst_17 = arith.constant 1.000000e+00 : f32
    %54 = vector.broadcast %cst_17 : f32 to vector<2x128xf32>
    %55 = arith.addf %54, %53 : vector<2x128xf32>
    %56 = arith.divf %54, %55 : vector<2x128xf32>
    %57 = math.tanh %51 : vector<2x128xf32>
    %58 = vector.extract_strided_slice %56 {offsets = [0, 0], sizes = [2, 32], strides = [1, 1]} : vector<2x128xf32> to vector<2x32xf32>
    %59 = vector.extract_strided_slice %56 {offsets = [0, 32], sizes = [2, 32], strides = [1, 1]} : vector<2x128xf32> to vector<2x32xf32>
    %60 = vector.extract_strided_slice %57 {offsets = [0, 64], sizes = [2, 32], strides = [1, 1]} : vector<2x128xf32> to vector<2x32xf32>
    %61 = vector.extract_strided_slice %56 {offsets = [0, 96], sizes = [2, 32], strides = [1, 1]} : vector<2x128xf32> to vector<2x32xf32>
    %62 = arith.mulf %59, %45 : vector<2x32xf32>
    %63 = arith.mulf %58, %60 : vector<2x32xf32>
    %64 = arith.addf %62, %63 : vector<2x32xf32>
    %65 = math.tanh %64 : vector<2x32xf32>
    %66 = arith.mulf %61, %65 : vector<2x32xf32>
    %c4 = arith.constant 4 : index
    %c0_18 = arith.constant 0 : index
    %67 = vector.load %arg10[%c4, %c0_18] : memref<16x32xf32, #tpu.memory_space<vmem>>, vector<2x32xf32>
    tpu.vector_store %arg10[%c4, %c0_18], %66 {strides = array<i32>} : memref<16x32xf32, #tpu.memory_space<vmem>>, vector<2x32xf32>,
    %68 = vector.extract_strided_slice %9 {offsets = [6, 0], sizes = [2, 128], strides = [1, 1]} : vector<16x128xf32> to vector<2x128xf32>
    %cst_19 = arith.constant dense<0.000000e+00> : vector<2x128xf32>
    %69 = tpu.matmul %66, %0, %cst_19 {dimension_numbers = #tpu.dot_dimension_numbers<[1], [0], [0], [1], [0, 0, 1, 1], [], []>} : vector<2x32xf32>, vector<32x128xf32>, vector<2x128xf32> -> vector<2x128xf32>
    %70 = arith.addf %68, %69 : vector<2x128xf32>
    %71 = arith.negf %70 : vector<2x128xf32>
    %72 = math.exp %71 : vector<2x128xf32>
    %cst_20 = arith.constant 1.000000e+00 : f32
    %73 = vector.broadcast %cst_20 : f32 to vector<2x128xf32>
    %74 = arith.addf %73, %72 : vector<2x128xf32>
    %75 = arith.divf %73, %74 : vector<2x128xf32>
    %76 = math.tanh %70 : vector<2x128xf32>
    %77 = vector.extract_strided_slice %75 {offsets = [0, 0], sizes = [2, 32], strides = [1, 1]} : vector<2x128xf32> to vector<2x32xf32>
    %78 = vector.extract_strided_slice %75 {offsets = [0, 32], sizes = [2, 32], strides = [1, 1]} : vector<2x128xf32> to vector<2x32xf32>
    %79 = vector.extract_strided_slice %76 {offsets = [0, 64], sizes = [2, 32], strides = [1, 1]} : vector<2x128xf32> to vector<2x32xf32>
    %80 = vector.extract_strided_slice %75 {offsets = [0, 96], sizes = [2, 32], strides = [1, 1]} : vector<2x128xf32> to vector<2x32xf32>
    %81 = arith.mulf %78, %64 : vector<2x32xf32>
    %82 = arith.mulf %77, %79 : vector<2x32xf32>
    %83 = arith.addf %81, %82 : vector<2x32xf32>
    %84 = math.tanh %83 : vector<2x32xf32>
    %85 = arith.mulf %80, %84 : vector<2x32xf32>
    %c6 = arith.constant 6 : index
    %c0_21 = arith.constant 0 : index
    %86 = vector.load %arg10[%c6, %c0_21] : memref<16x32xf32, #tpu.memory_space<vmem>>, vector<2x32xf32>
    tpu.vector_store %arg10[%c6, %c0_21], %85 {strides = array<i32>} : memref<16x32xf32, #tpu.memory_space<vmem>>, vector<2x32xf32>,
    %87 = vector.extract_strided_slice %9 {offsets = [8, 0], sizes = [2, 128], strides = [1, 1]} : vector<16x128xf32> to vector<2x128xf32>
    %cst_22 = arith.constant dense<0.000000e+00> : vector<2x128xf32>
    %88 = tpu.matmul %85, %0, %cst_22 {dimension_numbers = #tpu.dot_dimension_numbers<[1], [0], [0], [1], [0, 0, 1, 1], [], []>} : vector<2x32xf32>, vector<32x128xf32>, vector<2x128xf32> -> vector<2x128xf32>
    %89 = arith.addf %87, %88 : vector<2x128xf32>
    %90 = arith.negf %89 : vector<2x128xf32>
    %91 = math.exp %90 : vector<2x128xf32>
    %cst_23 = arith.constant 1.000000e+00 : f32
    %92 = vector.broadcast %cst_23 : f32 to vector<2x128xf32>
    %93 = arith.addf %92, %91 : vector<2x128xf32>
    %94 = arith.divf %92, %93 : vector<2x128xf32>
    %95 = math.tanh %89 : vector<2x128xf32>
    %96 = vector.extract_strided_slice %94 {offsets = [0, 0], sizes = [2, 32], strides = [1, 1]} : vector<2x128xf32> to vector<2x32xf32>
    %97 = vector.extract_strided_slice %94 {offsets = [0, 32], sizes = [2, 32], strides = [1, 1]} : vector<2x128xf32> to vector<2x32xf32>
    %98 = vector.extract_strided_slice %95 {offsets = [0, 64], sizes = [2, 32], strides = [1, 1]} : vector<2x128xf32> to vector<2x32xf32>
    %99 = vector.extract_strided_slice %94 {offsets = [0, 96], sizes = [2, 32], strides = [1, 1]} : vector<2x128xf32> to vector<2x32xf32>
    %100 = arith.mulf %97, %83 : vector<2x32xf32>
    %101 = arith.mulf %96, %98 : vector<2x32xf32>
    %102 = arith.addf %100, %101 : vector<2x32xf32>
    %103 = math.tanh %102 : vector<2x32xf32>
    %104 = arith.mulf %99, %103 : vector<2x32xf32>
    %c8 = arith.constant 8 : index
    %c0_24 = arith.constant 0 : index
    %105 = vector.load %arg10[%c8, %c0_24] : memref<16x32xf32, #tpu.memory_space<vmem>>, vector<2x32xf32>
    tpu.vector_store %arg10[%c8, %c0_24], %104 {strides = array<i32>} : memref<16x32xf32, #tpu.memory_space<vmem>>, vector<2x32xf32>,
    %106 = vector.extract_strided_slice %9 {offsets = [10, 0], sizes = [2, 128], strides = [1, 1]} : vector<16x128xf32> to vector<2x128xf32>
    %cst_25 = arith.constant dense<0.000000e+00> : vector<2x128xf32>
    %107 = tpu.matmul %104, %0, %cst_25 {dimension_numbers = #tpu.dot_dimension_numbers<[1], [0], [0], [1], [0, 0, 1, 1], [], []>} : vector<2x32xf32>, vector<32x128xf32>, vector<2x128xf32> -> vector<2x128xf32>
    %108 = arith.addf %106, %107 : vector<2x128xf32>
    %109 = arith.negf %108 : vector<2x128xf32>
    %110 = math.exp %109 : vector<2x128xf32>
    %cst_26 = arith.constant 1.000000e+00 : f32
    %111 = vector.broadcast %cst_26 : f32 to vector<2x128xf32>
    %112 = arith.addf %111, %110 : vector<2x128xf32>
    %113 = arith.divf %111, %112 : vector<2x128xf32>
    %114 = math.tanh %108 : vector<2x128xf32>
    %115 = vector.extract_strided_slice %113 {offsets = [0, 0], sizes = [2, 32], strides = [1, 1]} : vector<2x128xf32> to vector<2x32xf32>
    %116 = vector.extract_strided_slice %113 {offsets = [0, 32], sizes = [2, 32], strides = [1, 1]} : vector<2x128xf32> to vector<2x32xf32>
    %117 = vector.extract_strided_slice %114 {offsets = [0, 64], sizes = [2, 32], strides = [1, 1]} : vector<2x128xf32> to vector<2x32xf32>
    %118 = vector.extract_strided_slice %113 {offsets = [0, 96], sizes = [2, 32], strides = [1, 1]} : vector<2x128xf32> to vector<2x32xf32>
    %119 = arith.mulf %116, %102 : vector<2x32xf32>
    %120 = arith.mulf %115, %117 : vector<2x32xf32>
    %121 = arith.addf %119, %120 : vector<2x32xf32>
    %122 = math.tanh %121 : vector<2x32xf32>
    %123 = arith.mulf %118, %122 : vector<2x32xf32>
    %c10 = arith.constant 10 : index
    %c0_27 = arith.constant 0 : index
    %124 = vector.load %arg10[%c10, %c0_27] : memref<16x32xf32, #tpu.memory_space<vmem>>, vector<2x32xf32>
    tpu.vector_store %arg10[%c10, %c0_27], %123 {strides = array<i32>} : memref<16x32xf32, #tpu.memory_space<vmem>>, vector<2x32xf32>,
    %125 = vector.extract_strided_slice %9 {offsets = [12, 0], sizes = [2, 128], strides = [1, 1]} : vector<16x128xf32> to vector<2x128xf32>
    %cst_28 = arith.constant dense<0.000000e+00> : vector<2x128xf32>
    %126 = tpu.matmul %123, %0, %cst_28 {dimension_numbers = #tpu.dot_dimension_numbers<[1], [0], [0], [1], [0, 0, 1, 1], [], []>} : vector<2x32xf32>, vector<32x128xf32>, vector<2x128xf32> -> vector<2x128xf32>
    %127 = arith.addf %125, %126 : vector<2x128xf32>
    %128 = arith.negf %127 : vector<2x128xf32>
    %129 = math.exp %128 : vector<2x128xf32>
    %cst_29 = arith.constant 1.000000e+00 : f32
    %130 = vector.broadcast %cst_29 : f32 to vector<2x128xf32>
    %131 = arith.addf %130, %129 : vector<2x128xf32>
    %132 = arith.divf %130, %131 : vector<2x128xf32>
    %133 = math.tanh %127 : vector<2x128xf32>
    %134 = vector.extract_strided_slice %132 {offsets = [0, 0], sizes = [2, 32], strides = [1, 1]} : vector<2x128xf32> to vector<2x32xf32>
    %135 = vector.extract_strided_slice %132 {offsets = [0, 32], sizes = [2, 32], strides = [1, 1]} : vector<2x128xf32> to vector<2x32xf32>
    %136 = vector.extract_strided_slice %133 {offsets = [0, 64], sizes = [2, 32], strides = [1, 1]} : vector<2x128xf32> to vector<2x32xf32>
    %137 = vector.extract_strided_slice %132 {offsets = [0, 96], sizes = [2, 32], strides = [1, 1]} : vector<2x128xf32> to vector<2x32xf32>
    %138 = arith.mulf %135, %121 : vector<2x32xf32>
    %139 = arith.mulf %134, %136 : vector<2x32xf32>
    %140 = arith.addf %138, %139 : vector<2x32xf32>
    %141 = math.tanh %140 : vector<2x32xf32>
    %142 = arith.mulf %137, %141 : vector<2x32xf32>
    %c12 = arith.constant 12 : index
    %c0_30 = arith.constant 0 : index
    %143 = vector.load %arg10[%c12, %c0_30] : memref<16x32xf32, #tpu.memory_space<vmem>>, vector<2x32xf32>
    tpu.vector_store %arg10[%c12, %c0_30], %142 {strides = array<i32>} : memref<16x32xf32, #tpu.memory_space<vmem>>, vector<2x32xf32>,
    %144 = vector.extract_strided_slice %9 {offsets = [14, 0], sizes = [2, 128], strides = [1, 1]} : vector<16x128xf32> to vector<2x128xf32>
    %cst_31 = arith.constant dense<0.000000e+00> : vector<2x128xf32>
    %145 = tpu.matmul %142, %0, %cst_31 {dimension_numbers = #tpu.dot_dimension_numbers<[1], [0], [0], [1], [0, 0, 1, 1], [], []>} : vector<2x32xf32>, vector<32x128xf32>, vector<2x128xf32> -> vector<2x128xf32>
    %146 = arith.addf %144, %145 : vector<2x128xf32>
    %147 = arith.negf %146 : vector<2x128xf32>
    %148 = math.exp %147 : vector<2x128xf32>
    %cst_32 = arith.constant 1.000000e+00 : f32
    %149 = vector.broadcast %cst_32 : f32 to vector<2x128xf32>
    %150 = arith.addf %149, %148 : vector<2x128xf32>
    %151 = arith.divf %149, %150 : vector<2x128xf32>
    %152 = math.tanh %146 : vector<2x128xf32>
    %153 = vector.extract_strided_slice %151 {offsets = [0, 0], sizes = [2, 32], strides = [1, 1]} : vector<2x128xf32> to vector<2x32xf32>
    %154 = vector.extract_strided_slice %151 {offsets = [0, 32], sizes = [2, 32], strides = [1, 1]} : vector<2x128xf32> to vector<2x32xf32>
    %155 = vector.extract_strided_slice %152 {offsets = [0, 64], sizes = [2, 32], strides = [1, 1]} : vector<2x128xf32> to vector<2x32xf32>
    %156 = vector.extract_strided_slice %151 {offsets = [0, 96], sizes = [2, 32], strides = [1, 1]} : vector<2x128xf32> to vector<2x32xf32>
    %157 = arith.mulf %154, %140 : vector<2x32xf32>
    %158 = arith.mulf %153, %155 : vector<2x32xf32>
    %159 = arith.addf %157, %158 : vector<2x32xf32>
    %160 = math.tanh %159 : vector<2x32xf32>
    %161 = arith.mulf %156, %160 : vector<2x32xf32>
    %c14 = arith.constant 14 : index
    %c0_33 = arith.constant 0 : index
    %162 = vector.load %arg10[%c14, %c0_33] : memref<16x32xf32, #tpu.memory_space<vmem>>, vector<2x32xf32>
    tpu.vector_store %arg10[%c14, %c0_33], %161 {strides = array<i32>} : memref<16x32xf32, #tpu.memory_space<vmem>>, vector<2x32xf32>,
    %c0_34 = arith.constant 0 : index
    %c0_35 = arith.constant 0 : index
    %163 = vector.load %arg10[%c0_34, %c0_35] : memref<16x32xf32, #tpu.memory_space<vmem>>, vector<16x32xf32>
    %c0_36 = arith.constant 0 : index
    %c0_37 = arith.constant 0 : index
    %164 = vector.load %arg4[%c0_36, %c0_37] : memref<32x128xf32, #tpu.memory_space<vmem>>, vector<32x128xf32>
    %cst_38 = arith.constant dense<0.000000e+00> : vector<16x128xf32>
    %165 = tpu.matmul %163, %164, %cst_38 {dimension_numbers = #tpu.dot_dimension_numbers<[1], [0], [0], [1], [0, 0, 1, 1], [], []>} : vector<16x32xf32>, vector<32x128xf32>, vector<16x128xf32> -> vector<16x128xf32>
    %c0_39 = arith.constant 0 : index
    %c0_40 = arith.constant 0 : index
    %166 = vector.load %arg6[%c0_39, %c0_40] : memref<1x128xf32, #tpu.memory_space<vmem>>, vector<1x128xf32>
    %167 = vector.broadcast %166 : vector<1x128xf32> to vector<16x128xf32>
    %168 = arith.addf %165, %167 : vector<16x128xf32>
    %169 = vector.extract_strided_slice %168 {offsets = [0, 0], sizes = [2, 128], strides = [1, 1]} : vector<16x128xf32> to vector<2x128xf32>
    %cst_41 = arith.constant dense<0.000000e+00> : vector<2x128xf32>
    %170 = tpu.matmul %10, %1, %cst_41 {dimension_numbers = #tpu.dot_dimension_numbers<[1], [0], [0], [1], [0, 0, 1, 1], [], []>} : vector<2x32xf32>, vector<32x128xf32>, vector<2x128xf32> -> vector<2x128xf32>
    %171 = arith.addf %169, %170 : vector<2x128xf32>
    %172 = arith.negf %171 : vector<2x128xf32>
    %173 = math.exp %172 : vector<2x128xf32>
    %cst_42 = arith.constant 1.000000e+00 : f32
    %174 = vector.broadcast %cst_42 : f32 to vector<2x128xf32>
    %175 = arith.addf %174, %173 : vector<2x128xf32>
    %176 = arith.divf %174, %175 : vector<2x128xf32>
    %177 = math.tanh %171 : vector<2x128xf32>
    %178 = vector.extract_strided_slice %176 {offsets = [0, 0], sizes = [2, 32], strides = [1, 1]} : vector<2x128xf32> to vector<2x32xf32>
    %179 = vector.extract_strided_slice %176 {offsets = [0, 32], sizes = [2, 32], strides = [1, 1]} : vector<2x128xf32> to vector<2x32xf32>
    %180 = vector.extract_strided_slice %177 {offsets = [0, 64], sizes = [2, 32], strides = [1, 1]} : vector<2x128xf32> to vector<2x32xf32>
    %181 = vector.extract_strided_slice %176 {offsets = [0, 96], sizes = [2, 32], strides = [1, 1]} : vector<2x128xf32> to vector<2x32xf32>
    %182 = arith.mulf %179, %10 : vector<2x32xf32>
    %183 = arith.mulf %178, %180 : vector<2x32xf32>
    %184 = arith.addf %182, %183 : vector<2x32xf32>
    %185 = math.tanh %184 : vector<2x32xf32>
    %186 = arith.mulf %181, %185 : vector<2x32xf32>
    %187 = vector.extract_strided_slice %168 {offsets = [2, 0], sizes = [2, 128], strides = [1, 1]} : vector<16x128xf32> to vector<2x128xf32>
    %cst_43 = arith.constant dense<0.000000e+00> : vector<2x128xf32>
    %188 = tpu.matmul %186, %1, %cst_43 {dimension_numbers = #tpu.dot_dimension_numbers<[1], [0], [0], [1], [0, 0, 1, 1], [], []>} : vector<2x32xf32>, vector<32x128xf32>, vector<2x128xf32> -> vector<2x128xf32>
    %189 = arith.addf %187, %188 : vector<2x128xf32>
    %190 = arith.negf %189 : vector<2x128xf32>
    %191 = math.exp %190 : vector<2x128xf32>
    %cst_44 = arith.constant 1.000000e+00 : f32
    %192 = vector.broadcast %cst_44 : f32 to vector<2x128xf32>
    %193 = arith.addf %192, %191 : vector<2x128xf32>
    %194 = arith.divf %192, %193 : vector<2x128xf32>
    %195 = math.tanh %189 : vector<2x128xf32>
    %196 = vector.extract_strided_slice %194 {offsets = [0, 0], sizes = [2, 32], strides = [1, 1]} : vector<2x128xf32> to vector<2x32xf32>
    %197 = vector.extract_strided_slice %194 {offsets = [0, 32], sizes = [2, 32], strides = [1, 1]} : vector<2x128xf32> to vector<2x32xf32>
    %198 = vector.extract_strided_slice %195 {offsets = [0, 64], sizes = [2, 32], strides = [1, 1]} : vector<2x128xf32> to vector<2x32xf32>
    %199 = vector.extract_strided_slice %194 {offsets = [0, 96], sizes = [2, 32], strides = [1, 1]} : vector<2x128xf32> to vector<2x32xf32>
    %200 = arith.mulf %197, %184 : vector<2x32xf32>
    %201 = arith.mulf %196, %198 : vector<2x32xf32>
    %202 = arith.addf %200, %201 : vector<2x32xf32>
    %203 = math.tanh %202 : vector<2x32xf32>
    %204 = arith.mulf %199, %203 : vector<2x32xf32>
    %205 = vector.extract_strided_slice %168 {offsets = [4, 0], sizes = [2, 128], strides = [1, 1]} : vector<16x128xf32> to vector<2x128xf32>
    %cst_45 = arith.constant dense<0.000000e+00> : vector<2x128xf32>
    %206 = tpu.matmul %204, %1, %cst_45 {dimension_numbers = #tpu.dot_dimension_numbers<[1], [0], [0], [1], [0, 0, 1, 1], [], []>} : vector<2x32xf32>, vector<32x128xf32>, vector<2x128xf32> -> vector<2x128xf32>
    %207 = arith.addf %205, %206 : vector<2x128xf32>
    %208 = arith.negf %207 : vector<2x128xf32>
    %209 = math.exp %208 : vector<2x128xf32>
    %cst_46 = arith.constant 1.000000e+00 : f32
    %210 = vector.broadcast %cst_46 : f32 to vector<2x128xf32>
    %211 = arith.addf %210, %209 : vector<2x128xf32>
    %212 = arith.divf %210, %211 : vector<2x128xf32>
    %213 = math.tanh %207 : vector<2x128xf32>
    %214 = vector.extract_strided_slice %212 {offsets = [0, 0], sizes = [2, 32], strides = [1, 1]} : vector<2x128xf32> to vector<2x32xf32>
    %215 = vector.extract_strided_slice %212 {offsets = [0, 32], sizes = [2, 32], strides = [1, 1]} : vector<2x128xf32> to vector<2x32xf32>
    %216 = vector.extract_strided_slice %213 {offsets = [0, 64], sizes = [2, 32], strides = [1, 1]} : vector<2x128xf32> to vector<2x32xf32>
    %217 = vector.extract_strided_slice %212 {offsets = [0, 96], sizes = [2, 32], strides = [1, 1]} : vector<2x128xf32> to vector<2x32xf32>
    %218 = arith.mulf %215, %202 : vector<2x32xf32>
    %219 = arith.mulf %214, %216 : vector<2x32xf32>
    %220 = arith.addf %218, %219 : vector<2x32xf32>
    %221 = math.tanh %220 : vector<2x32xf32>
    %222 = arith.mulf %217, %221 : vector<2x32xf32>
    %223 = vector.extract_strided_slice %168 {offsets = [6, 0], sizes = [2, 128], strides = [1, 1]} : vector<16x128xf32> to vector<2x128xf32>
    %cst_47 = arith.constant dense<0.000000e+00> : vector<2x128xf32>
    %224 = tpu.matmul %222, %1, %cst_47 {dimension_numbers = #tpu.dot_dimension_numbers<[1], [0], [0], [1], [0, 0, 1, 1], [], []>} : vector<2x32xf32>, vector<32x128xf32>, vector<2x128xf32> -> vector<2x128xf32>
    %225 = arith.addf %223, %224 : vector<2x128xf32>
    %226 = arith.negf %225 : vector<2x128xf32>
    %227 = math.exp %226 : vector<2x128xf32>
    %cst_48 = arith.constant 1.000000e+00 : f32
    %228 = vector.broadcast %cst_48 : f32 to vector<2x128xf32>
    %229 = arith.addf %228, %227 : vector<2x128xf32>
    %230 = arith.divf %228, %229 : vector<2x128xf32>
    %231 = math.tanh %225 : vector<2x128xf32>
    %232 = vector.extract_strided_slice %230 {offsets = [0, 0], sizes = [2, 32], strides = [1, 1]} : vector<2x128xf32> to vector<2x32xf32>
    %233 = vector.extract_strided_slice %230 {offsets = [0, 32], sizes = [2, 32], strides = [1, 1]} : vector<2x128xf32> to vector<2x32xf32>
    %234 = vector.extract_strided_slice %231 {offsets = [0, 64], sizes = [2, 32], strides = [1, 1]} : vector<2x128xf32> to vector<2x32xf32>
    %235 = vector.extract_strided_slice %230 {offsets = [0, 96], sizes = [2, 32], strides = [1, 1]} : vector<2x128xf32> to vector<2x32xf32>
    %236 = arith.mulf %233, %220 : vector<2x32xf32>
    %237 = arith.mulf %232, %234 : vector<2x32xf32>
    %238 = arith.addf %236, %237 : vector<2x32xf32>
    %239 = math.tanh %238 : vector<2x32xf32>
    %240 = arith.mulf %235, %239 : vector<2x32xf32>
    %241 = vector.extract_strided_slice %168 {offsets = [8, 0], sizes = [2, 128], strides = [1, 1]} : vector<16x128xf32> to vector<2x128xf32>
    %cst_49 = arith.constant dense<0.000000e+00> : vector<2x128xf32>
    %242 = tpu.matmul %240, %1, %cst_49 {dimension_numbers = #tpu.dot_dimension_numbers<[1], [0], [0], [1], [0, 0, 1, 1], [], []>} : vector<2x32xf32>, vector<32x128xf32>, vector<2x128xf32> -> vector<2x128xf32>
    %243 = arith.addf %241, %242 : vector<2x128xf32>
    %244 = arith.negf %243 : vector<2x128xf32>
    %245 = math.exp %244 : vector<2x128xf32>
    %cst_50 = arith.constant 1.000000e+00 : f32
    %246 = vector.broadcast %cst_50 : f32 to vector<2x128xf32>
    %247 = arith.addf %246, %245 : vector<2x128xf32>
    %248 = arith.divf %246, %247 : vector<2x128xf32>
    %249 = math.tanh %243 : vector<2x128xf32>
    %250 = vector.extract_strided_slice %248 {offsets = [0, 0], sizes = [2, 32], strides = [1, 1]} : vector<2x128xf32> to vector<2x32xf32>
    %251 = vector.extract_strided_slice %248 {offsets = [0, 32], sizes = [2, 32], strides = [1, 1]} : vector<2x128xf32> to vector<2x32xf32>
    %252 = vector.extract_strided_slice %249 {offsets = [0, 64], sizes = [2, 32], strides = [1, 1]} : vector<2x128xf32> to vector<2x32xf32>
    %253 = vector.extract_strided_slice %248 {offsets = [0, 96], sizes = [2, 32], strides = [1, 1]} : vector<2x128xf32> to vector<2x32xf32>
    %254 = arith.mulf %251, %238 : vector<2x32xf32>
    %255 = arith.mulf %250, %252 : vector<2x32xf32>
    %256 = arith.addf %254, %255 : vector<2x32xf32>
    %257 = math.tanh %256 : vector<2x32xf32>
    %258 = arith.mulf %253, %257 : vector<2x32xf32>
    %259 = vector.extract_strided_slice %168 {offsets = [10, 0], sizes = [2, 128], strides = [1, 1]} : vector<16x128xf32> to vector<2x128xf32>
    %cst_51 = arith.constant dense<0.000000e+00> : vector<2x128xf32>
    %260 = tpu.matmul %258, %1, %cst_51 {dimension_numbers = #tpu.dot_dimension_numbers<[1], [0], [0], [1], [0, 0, 1, 1], [], []>} : vector<2x32xf32>, vector<32x128xf32>, vector<2x128xf32> -> vector<2x128xf32>
    %261 = arith.addf %259, %260 : vector<2x128xf32>
    %262 = arith.negf %261 : vector<2x128xf32>
    %263 = math.exp %262 : vector<2x128xf32>
    %cst_52 = arith.constant 1.000000e+00 : f32
    %264 = vector.broadcast %cst_52 : f32 to vector<2x128xf32>
    %265 = arith.addf %264, %263 : vector<2x128xf32>
    %266 = arith.divf %264, %265 : vector<2x128xf32>
    %267 = math.tanh %261 : vector<2x128xf32>
    %268 = vector.extract_strided_slice %266 {offsets = [0, 0], sizes = [2, 32], strides = [1, 1]} : vector<2x128xf32> to vector<2x32xf32>
    %269 = vector.extract_strided_slice %266 {offsets = [0, 32], sizes = [2, 32], strides = [1, 1]} : vector<2x128xf32> to vector<2x32xf32>
    %270 = vector.extract_strided_slice %267 {offsets = [0, 64], sizes = [2, 32], strides = [1, 1]} : vector<2x128xf32> to vector<2x32xf32>
    %271 = vector.extract_strided_slice %266 {offsets = [0, 96], sizes = [2, 32], strides = [1, 1]} : vector<2x128xf32> to vector<2x32xf32>
    %272 = arith.mulf %269, %256 : vector<2x32xf32>
    %273 = arith.mulf %268, %270 : vector<2x32xf32>
    %274 = arith.addf %272, %273 : vector<2x32xf32>
    %275 = math.tanh %274 : vector<2x32xf32>
    %276 = arith.mulf %271, %275 : vector<2x32xf32>
    %277 = vector.extract_strided_slice %168 {offsets = [12, 0], sizes = [2, 128], strides = [1, 1]} : vector<16x128xf32> to vector<2x128xf32>
    %cst_53 = arith.constant dense<0.000000e+00> : vector<2x128xf32>
    %278 = tpu.matmul %276, %1, %cst_53 {dimension_numbers = #tpu.dot_dimension_numbers<[1], [0], [0], [1], [0, 0, 1, 1], [], []>} : vector<2x32xf32>, vector<32x128xf32>, vector<2x128xf32> -> vector<2x128xf32>
    %279 = arith.addf %277, %278 : vector<2x128xf32>
    %280 = arith.negf %279 : vector<2x128xf32>
    %281 = math.exp %280 : vector<2x128xf32>
    %cst_54 = arith.constant 1.000000e+00 : f32
    %282 = vector.broadcast %cst_54 : f32 to vector<2x128xf32>
    %283 = arith.addf %282, %281 : vector<2x128xf32>
    %284 = arith.divf %282, %283 : vector<2x128xf32>
    %285 = math.tanh %279 : vector<2x128xf32>
    %286 = vector.extract_strided_slice %284 {offsets = [0, 0], sizes = [2, 32], strides = [1, 1]} : vector<2x128xf32> to vector<2x32xf32>
    %287 = vector.extract_strided_slice %284 {offsets = [0, 32], sizes = [2, 32], strides = [1, 1]} : vector<2x128xf32> to vector<2x32xf32>
    %288 = vector.extract_strided_slice %285 {offsets = [0, 64], sizes = [2, 32], strides = [1, 1]} : vector<2x128xf32> to vector<2x32xf32>
    %289 = vector.extract_strided_slice %284 {offsets = [0, 96], sizes = [2, 32], strides = [1, 1]} : vector<2x128xf32> to vector<2x32xf32>
    %290 = arith.mulf %287, %274 : vector<2x32xf32>
    %291 = arith.mulf %286, %288 : vector<2x32xf32>
    %292 = arith.addf %290, %291 : vector<2x32xf32>
    %293 = math.tanh %292 : vector<2x32xf32>
    %294 = arith.mulf %289, %293 : vector<2x32xf32>
    %295 = vector.extract_strided_slice %168 {offsets = [14, 0], sizes = [2, 128], strides = [1, 1]} : vector<16x128xf32> to vector<2x128xf32>
    %cst_55 = arith.constant dense<0.000000e+00> : vector<2x128xf32>
    %296 = tpu.matmul %294, %1, %cst_55 {dimension_numbers = #tpu.dot_dimension_numbers<[1], [0], [0], [1], [0, 0, 1, 1], [], []>} : vector<2x32xf32>, vector<32x128xf32>, vector<2x128xf32> -> vector<2x128xf32>
    %297 = arith.addf %295, %296 : vector<2x128xf32>
    %298 = arith.negf %297 : vector<2x128xf32>
    %299 = math.exp %298 : vector<2x128xf32>
    %cst_56 = arith.constant 1.000000e+00 : f32
    %300 = vector.broadcast %cst_56 : f32 to vector<2x128xf32>
    %301 = arith.addf %300, %299 : vector<2x128xf32>
    %302 = arith.divf %300, %301 : vector<2x128xf32>
    %303 = math.tanh %297 : vector<2x128xf32>
    %304 = vector.extract_strided_slice %302 {offsets = [0, 0], sizes = [2, 32], strides = [1, 1]} : vector<2x128xf32> to vector<2x32xf32>
    %305 = vector.extract_strided_slice %302 {offsets = [0, 32], sizes = [2, 32], strides = [1, 1]} : vector<2x128xf32> to vector<2x32xf32>
    %306 = vector.extract_strided_slice %303 {offsets = [0, 64], sizes = [2, 32], strides = [1, 1]} : vector<2x128xf32> to vector<2x32xf32>
    %307 = vector.extract_strided_slice %302 {offsets = [0, 96], sizes = [2, 32], strides = [1, 1]} : vector<2x128xf32> to vector<2x32xf32>
    %308 = arith.mulf %305, %292 : vector<2x32xf32>
    %309 = arith.mulf %304, %306 : vector<2x32xf32>
    %310 = arith.addf %308, %309 : vector<2x32xf32>
    %311 = math.tanh %310 : vector<2x32xf32>
    %312 = arith.mulf %307, %311 : vector<2x32xf32>
    %c0_57 = arith.constant 0 : index
    %c0_58 = arith.constant 0 : index
    %313 = vector.load %arg7[%c0_57, %c0_58] : memref<32x1xf32, #tpu.memory_space<vmem>>, vector<32x1xf32>
    %cst_59 = arith.constant dense<0.000000e+00> : vector<2x1xf32>
    %314 = tpu.matmul %312, %313, %cst_59 {dimension_numbers = #tpu.dot_dimension_numbers<[1], [0], [0], [1], [0, 0, 1, 1], [], []>} : vector<2x32xf32>, vector<32x1xf32>, vector<2x1xf32> -> vector<2x1xf32>
    %c0_60 = arith.constant 0 : index
    %c0_61 = arith.constant 0 : index
    %315 = vector.load %arg8[%c0_60, %c0_61] : memref<1x1xf32, #tpu.memory_space<vmem>>, vector<1x1xf32>
    %316 = vector.broadcast %315 : vector<1x1xf32> to vector<2x1xf32>
    %317 = arith.addf %314, %316 : vector<2x1xf32>
    %c0_62 = arith.constant 0 : index
    %c0_63 = arith.constant 0 : index
    %318 = vector.load %arg9[%c0_62, %c0_63] : memref<2x1xf32, #tpu.memory_space<vmem>>, vector<2x1xf32>
    tpu.vector_store %arg9[%c0_62, %c0_63], %317 {strides = array<i32>} : memref<2x1xf32, #tpu.memory_space<vmem>>, vector<2x1xf32>,
    return
  }
}

</mosaic_0001>

<bundles_post_ra>
// kernel: tpu_custom_call.1
= control target key start
LH: loop header
LB: loop body
LE: loop exit
PB: predicated region body
PF: predicated region fallthrough
CT: control target
= control target key end

     0   :  { %s3023_s0 = inlined_call_operand.vmem [shape: f32[16,1], index: 0, kind: input, shape index: {}]   ;;  %s3024_s1 = inlined_call_operand.vmem [shape: f32[1,128], index: 1, kind: input, shape index: {}]   ;;  %s3025_s2 = inlined_call_operand.vmem [shape: f32[32,128], index: 2, kind: input, shape index: {}]   ;;  %s3026_s3 = inlined_call_operand.hbm [shape: f32[1,128], index: 3, kind: input, shape index: {}]   ;;  %s3027_s4 = inlined_call_operand.vmem [shape: f32[32,128], index: 4, kind: input, shape index: {}]   ;;  %s3028_s5 = inlined_call_operand.hbm [shape: f32[32,128], index: 5, kind: input, shape index: {}]   ;;  %s3029_s6 = inlined_call_operand.vmem [shape: f32[1,128], index: 6, kind: input, shape index: {}]   ;;  %s3030_s7 = inlined_call_operand.vmem [shape: f32[32,1], index: 7, kind: input, shape index: {}]   ;;  %s3031_s8 = inlined_call_operand.<no memory space> [shape: f32[1,1], index: 8, kind: input, shape index: {}]   ;;  %s3032_s9 = inlined_call_operand.vmem [shape: f32[2,1], index: 9, kind: output, shape index: {}]  }
   0x1   :  { %v14_v0 = vstv %s3031_s8 }
   0x2   :  { %15 = vst [vmem:[#allocation3] sm:$0x1] %v14_v0 }
   0x3   :  { %16 = vsyncpa [#allocation5], 0 }
   0x4   :  { %17 = vsyncpa [#allocation7], 0  ;;  %s2626_s11 = smov [#allocation4]   ;;  %s2627_s13 = smov [#allocation6]  }
   0x5   :  { %s30_s12 = sshll.u32 %s2626_s11, 4  ;;  %s41_s14 = sshll.u32 %s2627_s13, 4  ;;  %s31_s12 = int_to_ptr.vmem [resolvable:$true] %s30_s12  ;;  %s2689_s14 = int_to_ptr.vmem [resolvable:$true] %s41_s14 }
   0x6   :  { %s2578_s17 = scalar_lea.hbm %s3026_s3, 16 }
   0x7   :  { %p2579_p0 = scmp.ne.s32.totalorder %s3026_s3, %s2578_s17  ;;  %p2582_p1 = scmp.lt.u32.totalorder %s2578_s17, %s3026_s3 }
   0x9   :  { %p2584_p2 = pnand %p2582_p1, %p2579_p0 }
   0xb   :  { %2587 = shalt.err (!%p2584_p2)
}
   0xc   :  { %s2588_s21 = scalar_lea.vmem %s31_s12, 16  ;;  %s2592_s22 = scalar_lea.vmem %s31_s12, 32 }
   0xd   :  { %p2589_p3 = scmp.ne.s32.totalorder %s31_s12, %s2588_s21  ;;  %p2593_p4 = scmp.lt.s32.totalorder %s31_s12, %s31_s12 }
   0xe   :  { %p2594_p5 = scmp.lt.s32.totalorder %s2592_s22, %s2588_s21 }
  0x10   :  { %p2595_p6 = por %p2594_p5, %p2593_p4 }
  0x12   :  { %p2596_p7 = pnand %p2595_p6, %p2589_p3 }
  0x14   :  { %2599 = shalt.err (!%p2596_p7)
}
  0x15   :  { %33 = dma.hbm_to_vmem [thread:$0]  %s3026_s3, 16, %s31_s12, [#allocation5]  }
  0x16   :  { %s2600_s27 = scalar_lea.hbm %s3028_s5, 512 }
  0x17   :  { %p2601_p8 = scmp.ne.s32.totalorder %s3028_s5, %s2600_s27  ;;  %p2604_p9 = scmp.lt.u32.totalorder %s2600_s27, %s3028_s5 }
  0x19   :  { %p2606_p10 = pnand %p2604_p9, %p2601_p8 }
  0x1b   :  { %2609 = shalt.err (!%p2606_p10)
}
  0x1c   :  { %s2610_s11 = scalar_lea.vmem %s2689_s14, 512  ;;  %p2615_p12 = scmp.lt.s32.totalorder %s2689_s14, %s2689_s14 }
  0x1d   :  { %p2611_p11 = scmp.ne.s32.totalorder %s2689_s14, %s2610_s11  ;;  %p2616_p13 = scmp.lt.s32.totalorder %s2610_s11, %s2610_s11 }
  0x1f   :  { %p2617_p0 = por %p2616_p13, %p2615_p12 }
  0x21   :  { %p2618_p1 = pnand %p2617_p0, %p2611_p11 }
  0x23   :  { %2621 = shalt.err (!%p2618_p1)
}
  0x24   :  { %s2628_s3 = smov 128   ;;  %s2629_s12 = smov 8  }
  0x25   :  { %47 = dma.hbm_to_vmem [thread:$0]  %s3028_s5, 512, %s2689_s14, [#allocation7], %s2628_s3, %s2628_s3, %s2629_s12  }
  0x26   :  { %2622 = dma.done.wait [#allocation5], 16  }
  0x27   :  { %2623 = vsyncadd [#allocation5], 4294967280 }
  0x28   :  { %2624 = dma.done.wait [#allocation7], 512  }
  0x29   :  { %2625 = vsyncadd [#allocation7], 4294966784  ;;  %v2630_v1 = vmov 0.0|0.0   ;;  %vm2631_vm0 = vmmov 0   ;;  %v2632_v2 = vmov 0.0   ;;  %v2633_v3 = vmov 0  }
  0x2a   :  { %2328 = vmatprep.subr.bf16.mxu0 %v2630_v1  ;;  %2138 = vmatprep.mubr.msk.f32.mxu0 %vm2631_vm0, %v2632_v2  ;;  %v60_v4 = vld [vmem:[%s3025_s2] sm:$0xff]  ;;  %v61_v5 = vld [vmem:[%s3025_s2 + $0x8] sm:$0xff]  ;;  %v62_v6 = vld [vmem:[%s3025_s2 + $0x10] sm:$0xff]  ;;  %s2634_s24 = smov 64   ;;  %vm201_vm1 = vcmask 254976   ;;  %vm98_vm2 = vcmask 261120  }
  0x2b   :  { %2448 = vset.pattern.permute.xlu0 %v2633_v3  ;;  %2334 = vmatprep.subr.bf16.mxu1 %v2630_v1  ;;  %v2735_v7 = vpack.c.bf16 %v61_v5, %v60_v4  ;;  %v63_v8 = vld [vmem:[%s3025_s2 + $0x18] sm:$0xff]  ;;  %v68_v9 = vld [vmem:[%s3023_s0] sm:$0xff]  ;;  %v2766_v14 = vld [vmem:[#allocation4] ss:$0 sm:$0xff]  ;;  %vm310_vm3 = vcmask 257026   ;;  %vm534_vm4 = vcmask 261126  }
  0x2c   :  { %2149 = vmatprep.mubr.msk.f32.mxu1 %vm2631_vm0, %v2632_v2  ;;  %2449 = vset.pattern.permute.xlu1 %v2633_v3  ;;  %v2744_v10 = vpack.c.bf16 %v63_v8, %v62_v6  ;;  %v2763_v11 = vld [vmem:[%s3024_s1] ss:$0 sm:$0xff]  ;;  %s2635_s1 = smov 32   ;;  %vm422_vm5 = vcmask 259076   ;;  %vm1994_vm6 = vcmask 1024  }
  0x2d   :  { %73 = vperm.xlu0 %2448, %v68_v9   ;;  %2330 = vmatpush3.bf16.msra.mxu0 %v2735_v7 }
  0x2e   :  { %2336 = vmatpush3.bf16.msra.mxu1 %v2735_v7  ;;  %2331 = vmatprep.subr.bf16.mxu0 %v2630_v1 }
  0x2f   :  { %2337 = vmatprep.subr.bf16.mxu1 %v2630_v1 }
  0x31   :  { %2333 = vmatpush3.bf16.msra.mxu0 %v2744_v10 }
  0x32   :  { %2339 = vmatpush3.bf16.msra.mxu1 %v2744_v10  ;;  %2340 = vmatprep.subr.bf16.mxu0 %v2630_v1 }
  0x33   :  { %2346 = vmatprep.subr.bf16.mxu1 %v2630_v1 }
  0x34   :  { %2139 = vmatmul.mubr.f32.vlgmr.msra.gmra.mrb[0].mxu0 %v2632_v2 }
  0x35   :  { %2342 = vmatpush3.bf16.msra.mxu0 %v2735_v7  ;;  %2160 = vmatprep.mubr.msk.f32.mxu0 %vm2631_vm0, %v2632_v2 }
  0x36   :  { %2343 = vmatprep.subr.bf16.mxu0 %v2630_v1 }
  0x39   :  { %2345 = vmatpush3.bf16.msra.mxu0 %v2744_v10 }
  0x3a   :  { %2352 = vmatprep.subr.bf16.mxu0 %v2630_v1 }
  0xac   :  { %v74_v12 = vpop.permute.xlu0 %73 }
  0xad   :  { %v87_v13 = vmul.f32 %v2763_v11, %v74_v12 }
  0xaf   :  { %v2769_v15 = vadd.f32 %v2766_v14, %v87_v13 }
 0x107   :  { %v168_v16 = vpop.f32.mrb[0].mxu0 }
 0x108   :  { %v172_v17 = vadd.f32 %v168_v16, %v2769_v15  ;;  %v2140_v18 = vpop.f32.mrb[1].mxu0 }
 0x10a   :  { %2450 = vtanh.f32 %v172_v17  ;;  %v2004_v20 = vmul.f32 -1.442695, %v172_v17 }
 0x10c   :  { %2452 = vpow2.f32 %v2004_v20 }
 0x114   :  { %v2451_v19 = vpop.eup %2450 }
 0x115   :  { %182 = vrot.lane.b32.xlu0 %v2451_v19, %s2634_s24 }
 0x116   :  { %v2453_v21 = vpop.eup %2452 }
 0x117   :  { %v176_v22 = vadd.f32 1.0, %v2453_v21 }
 0x119   :  { %2454 = vrcp.f32 %v176_v22 }
 0x123   :  { %v2455_v23 = vpop.eup %2454 }
 0x124   :  { %v180_v26 = vmul.f32 0.0, %v2455_v23 }
 0x187   :  { %v183_v24 = vpop.permute.xlu0 %182 }
 0x188   :  { %v185_v25 = vmul.f32 %v2455_v23, %v183_v24 }
 0x18a   :  { %187 = vrot.lane.b32.xlu1 %v185_v25, %s2635_s1 }
 0x1fc   :  { %v188_v27 = vpop.permute.xlu1 %187 }
 0x1fd   :  { %v190_v28 = vadd.f32 %v188_v27, %v180_v26 }
 0x1ff   :  { %2456 = vtanh.f32 %v190_v28  ;;  %v287_v44 = vrot.slane %v190_v28, 6 }
 0x209   :  { %v2457_v29 = vpop.eup %2456 }
 0x20a   :  { %193 = vrot.lane.b32.xlu1 %v2457_v29, %s2634_s24 }
 0x27c   :  { %v194_v30 = vpop.permute.xlu1 %193 }
 0x27d   :  { %v196_v31 = vmul.f32 %v2455_v23, %v194_v30 }
 0x27f   :  { %198 = vrot.lane.b32.xlu0 %v196_v31, %s2635_s1  ;;  %v69_v31 = vld [vmem:[%s3023_s0 + $0x8] sm:$0xff] }
 0x2f1   :  { %v199_v32 = vpop.permute.xlu0 %198 }
 0x2f2   :  { %202 = vst.msk [vmem:[#allocation2] sm:$0x3] %vm201_vm1, %v199_v32  ;;  %2150 = vmatmul.mubr.msk.f32.vlgmr.msra.gmra.mrb[0].mxu1 %vm98_vm2, %v199_v32 }
 0x2f3   :  { %2348 = vmatpush3.bf16.msra.mxu1 %v2735_v7  ;;  %2171 = vmatprep.mubr.msk.f32.mxu1 %vm2631_vm0, %v2632_v2 }
 0x2f4   :  { %2349 = vmatprep.subr.bf16.mxu1 %v2630_v1 }
 0x2f7   :  { %2351 = vmatpush3.bf16.msra.mxu1 %v2744_v10 }
 0x2f8   :  { %2358 = vmatprep.subr.bf16.mxu1 %v2630_v1 }
 0x3c5   :  { %v271_v33 = vpop.f32.mrb[0].mxu1 }
 0x3c6   :  { %v276_v34 = vrot.slane %v271_v33, 6  ;;  %v2151_v35 = vpop.f32.mrb[1].mxu1 }
 0x3c8   :  { %v278_v36 = vadd.f32 %v276_v34, %v2769_v15 }
 0x3ca   :  { %2458 = vtanh.f32 %v278_v36  ;;  %v2006_v38 = vmul.f32 -1.442695, %v278_v36 }
 0x3cc   :  { %2460 = vpow2.f32 %v2006_v38 }
 0x3d4   :  { %v2459_v37 = vpop.eup %2458 }
 0x3d5   :  { %291 = vrot.lane.b32.xlu1 %v2459_v37, %s2634_s24 }
 0x3d6   :  { %v2461_v39 = vpop.eup %2460 }
 0x3d7   :  { %v282_v40 = vadd.f32 1.0, %v2461_v39 }
 0x3d9   :  { %2462 = vrcp.f32 %v282_v40 }
 0x3e3   :  { %v2463_v41 = vpop.eup %2462 }
 0x3e4   :  { %v289_v45 = vmul.f32 %v2463_v41, %v287_v44 }
 0x447   :  { %v292_v42 = vpop.permute.xlu1 %291 }
 0x448   :  { %v294_v43 = vmul.f32 %v2463_v41, %v292_v42 }
 0x44a   :  { %296 = vrot.lane.b32.xlu0 %v294_v43, %s2635_s1 }
 0x4bc   :  { %v297_v46 = vpop.permute.xlu0 %296 }
 0x4bd   :  { %v299_v47 = vadd.f32 %v297_v46, %v289_v45 }
 0x4bf   :  { %2464 = vtanh.f32 %v299_v47  ;;  %v399_v0 = vrot.slane %v299_v47, 6 }
 0x4c9   :  { %v2465_v48 = vpop.eup %2464 }
 0x4ca   :  { %302 = vrot.lane.b32.xlu1 %v2465_v48, %s2634_s24 }
 0x53c   :  { %v303_v49 = vpop.permute.xlu1 %302 }
 0x53d   :  { %v2788_v50 = vmul.f32 %v2463_v41, %v303_v49 }
 0x53f   :  { %v312_v51 = vrot.slane %v2788_v50, 2 }
 0x541   :  { %313 = vrot.lane.b32.xlu0 %v312_v51, %s2635_s1 }
 0x5b3   :  { %v314_v52 = vpop.permute.xlu0 %313 }
 0x5b4   :  { %2161 = vmatmul.mubr.msk.f32.vlgmr.msra.gmra.mrb[2].mxu0 %vm98_vm2, %v314_v52 }
 0x5b5   :  { %2354 = vmatpush3.bf16.msra.mxu0 %v2735_v7  ;;  %2182 = vmatprep.mubr.msk.f32.mxu0 %vm2631_vm0, %v2632_v2 }
 0x5b6   :  { %2355 = vmatprep.subr.bf16.mxu0 %v2630_v1 }
 0x5b9   :  { %2357 = vmatpush3.bf16.msra.mxu0 %v2744_v10 }
 0x5ba   :  { %2364 = vmatprep.subr.bf16.mxu0 %v2630_v1 }
 0x687   :  { %v383_v53 = vpop.f32.mrb[2].mxu0 }
 0x688   :  { %v388_v54 = vrot.slane %v383_v53, 4  ;;  %v2162_v55 = vpop.f32.mrb[3].mxu0 }
 0x68a   :  { %v390_v56 = vadd.f32 %v388_v54, %v2769_v15 }
 0x68c   :  { %2466 = vtanh.f32 %v390_v56  ;;  %v2008_v58 = vmul.f32 -1.442695, %v390_v56 }
 0x68e   :  { %2468 = vpow2.f32 %v2008_v58 }
 0x696   :  { %v2467_v57 = vpop.eup %2466 }
 0x697   :  { %403 = vrot.lane.b32.xlu1 %v2467_v57, %s2634_s24 }
 0x698   :  { %v2469_v59 = vpop.eup %2468 }
 0x699   :  { %v394_v60 = vadd.f32 1.0, %v2469_v59 }
 0x69b   :  { %2470 = vrcp.f32 %v394_v60 }
 0x6a5   :  { %v2471_v61 = vpop.eup %2470 }
 0x6a6   :  { %v401_v3 = vmul.f32 %v2471_v61, %v399_v0 }
 0x709   :  { %v404_v62 = vpop.permute.xlu1 %403 }
 0x70a   :  { %v406_v63 = vmul.f32 %v2471_v61, %v404_v62 }
 0x70c   :  { %408 = vrot.lane.b32.xlu0 %v406_v63, %s2635_s1 }
 0x77e   :  { %v409_v4 = vpop.permute.xlu0 %408 }
 0x77f   :  { %v411_v5 = vadd.f32 %v409_v4, %v401_v3 }
 0x781   :  { %2472 = vtanh.f32 %v411_v5  ;;  %v511_v27 = vrot.slane %v411_v5, 6 }
 0x78b   :  { %v2473_v6 = vpop.eup %2472 }
 0x78c   :  { %414 = vrot.lane.b32.xlu1 %v2473_v6, %s2634_s24 }
 0x7fe   :  { %v415_v8 = vpop.permute.xlu1 %414 }
 0x7ff   :  { %v2803_v9 = vmul.f32 %v2471_v61, %v415_v8 }
 0x801   :  { %v424_v12 = vrot.slane %v2803_v9, 4 }
 0x803   :  { %425 = vrot.lane.b32.xlu0 %v424_v12, %s2635_s1 }
 0x875   :  { %v426_v13 = vpop.permute.xlu0 %425 }
 0x876   :  { %2172 = vmatmul.mubr.msk.f32.vlgmr.msra.gmra.mrb[2].mxu1 %vm98_vm2, %v426_v13 }
 0x877   :  { %2360 = vmatpush3.bf16.msra.mxu1 %v2735_v7  ;;  %2193 = vmatprep.mubr.msk.f32.mxu1 %vm2631_vm0, %v2632_v2 }
 0x878   :  { %2361 = vmatprep.subr.bf16.mxu1 %v2630_v1 }
 0x87b   :  { %2363 = vmatpush3.bf16.msra.mxu1 %v2744_v10 }
 0x87c   :  { %2370 = vmatprep.subr.bf16.mxu1 %v2630_v1 }
 0x949   :  { %v495_v16 = vpop.f32.mrb[2].mxu1 }
 0x94a   :  { %v500_v17 = vrot.slane %v495_v16, 2  ;;  %v2173_v18 = vpop.f32.mrb[3].mxu1 }
 0x94c   :  { %v502_v19 = vadd.f32 %v500_v17, %v2769_v15 }
 0x94e   :  { %2474 = vtanh.f32 %v502_v19  ;;  %v2010_v21 = vmul.f32 -1.442695, %v502_v19 }
 0x950   :  { %2476 = vpow2.f32 %v2010_v21 }
 0x958   :  { %v2475_v20 = vpop.eup %2474 }
 0x959   :  { %515 = vrot.lane.b32.xlu1 %v2475_v20, %s2634_s24 }
 0x95a   :  { %v2477_v22 = vpop.eup %2476 }
 0x95b   :  { %v506_v23 = vadd.f32 1.0, %v2477_v22 }
 0x95d   :  { %2478 = vrcp.f32 %v506_v23 }
 0x967   :  { %v2479_v24 = vpop.eup %2478 }
 0x968   :  { %v513_v28 = vmul.f32 %v2479_v24, %v511_v27 }
 0x9cb   :  { %v516_v25 = vpop.permute.xlu1 %515 }
 0x9cc   :  { %v518_v26 = vmul.f32 %v2479_v24, %v516_v25 }
 0x9ce   :  { %520 = vrot.lane.b32.xlu0 %v518_v26, %s2635_s1 }
 0xa40   :  { %v521_v29 = vpop.permute.xlu0 %520 }
 0xa41   :  { %v523_v30 = vadd.f32 %v521_v29, %v513_v28 }
 0xa43   :  { %2480 = vtanh.f32 %v523_v30 }
 0xa4d   :  { %v2481_v15 = vpop.eup %2480 }
 0xa4e   :  { %526 = vrot.lane.b32.xlu1 %v2481_v15, %s2634_s24 }
 0xa52   :  { %78 = vperm.xlu1 %2449, %v69_v31  }
 0xac0   :  { %v527_v32 = vpop.permute.xlu1 %526 }
 0xac1   :  { %v2821_v33 = vmul.f32 %v2479_v24, %v527_v32 }
 0xac3   :  { %v536_v34 = vrot.slane %v2821_v33, 6 }
 0xac5   :  { %537 = vrot.lane.b32.xlu0 %v536_v34, %s2635_s1 }
 0xad1   :  { %v79_v36 = vpop.permute.xlu1 %78 }
 0xad2   :  { %v88_v37 = vmul.f32 %v2763_v11, %v79_v36  ;;  %v620_v11 = vrot.slane %v523_v30, 6 }
 0xad4   :  { %v2833_v38 = vadd.f32 %v2766_v14, %v88_v37 }
 0xb37   :  { %v538_v35 = vpop.permute.xlu0 %537 }
 0xb38   :  { %2183 = vmatmul.mubr.msk.f32.vlgmr.msra.gmra.mrb[4].mxu0 %vm98_vm2, %v538_v35 }
 0xb39   :  { %2366 = vmatpush3.bf16.msra.mxu0 %v2735_v7  ;;  %2204 = vmatprep.mubr.msk.f32.mxu0 %vm2631_vm0, %v2632_v2 }
 0xb3a   :  { %2367 = vmatprep.subr.bf16.mxu0 %v2630_v1 }
 0xb3d   :  { %2369 = vmatpush3.bf16.msra.mxu0 %v2744_v10 }
 0xc0b   :  { %v607_v39 = vpop.f32.mrb[4].mxu0 }
 0xc0c   :  { %v611_v40 = vadd.f32 %v607_v39, %v2833_v38  ;;  %v2184_v41 = vpop.f32.mrb[5].mxu0 }
 0xc0e   :  { %2482 = vtanh.f32 %v611_v40  ;;  %v2012_v43 = vmul.f32 -1.442695, %v611_v40 }
 0xc10   :  { %2484 = vpow2.f32 %v2012_v43 }
 0xc18   :  { %v2483_v42 = vpop.eup %2482 }
 0xc19   :  { %624 = vrot.lane.b32.xlu0 %v2483_v42, %s2634_s24 }
 0xc1a   :  { %v2485_v44 = vpop.eup %2484 }
 0xc1b   :  { %v615_v45 = vadd.f32 1.0, %v2485_v44 }
 0xc1d   :  { %2486 = vrcp.f32 %v615_v45 }
 0xc27   :  { %v2487_v46 = vpop.eup %2486 }
 0xc28   :  { %v622_v14 = vmul.f32 %v2487_v46, %v620_v11 }
 0xc8b   :  { %v625_v47 = vpop.permute.xlu0 %624 }
 0xc8c   :  { %v627_v48 = vmul.f32 %v2487_v46, %v625_v47 }
 0xc8e   :  { %629 = vrot.lane.b32.xlu1 %v627_v48, %s2635_s1 }
 0xd00   :  { %v630_v49 = vpop.permute.xlu1 %629 }
 0xd01   :  { %v632_v51 = vadd.f32 %v630_v49, %v622_v14 }
 0xd03   :  { %2488 = vtanh.f32 %v632_v51 }
 0xd0d   :  { %v2489_v52 = vpop.eup %2488 }
 0xd0e   :  { %635 = vrot.lane.b32.xlu0 %v2489_v52, %s2634_s24 }
 0xd80   :  { %v636_v53 = vpop.permute.xlu0 %635 }
 0xd81   :  { %v638_v54 = vmul.f32 %v2487_v46, %v636_v53 }
 0xd83   :  { %640 = vrot.lane.b32.xlu1 %v638_v54, %s2635_s1 }
 0xdf5   :  { %v641_v55 = vpop.permute.xlu1 %640 }
 0xdf6   :  { %643 = vst.msk [vmem:[#allocation2 + $0x8] sm:$0x3] %vm201_vm1, %v641_v55  ;;  %2194 = vmatmul.mubr.msk.f32.vlgmr.msra.gmra.mrb[4].mxu1 %vm98_vm2, %v641_v55  ;;  %v977_v55 = vld [vmem:[%s3027_s4 + $0x8] sm:$0xff] }
 0xdf7   :  { %2372 = vmatpush3.bf16.msra.mxu1 %v2735_v7  ;;  %2215 = vmatprep.mubr.msk.f32.mxu1 %vm2631_vm0, %v2632_v2 }
 0xdf8   :  { %2373 = vmatprep.subr.bf16.mxu1 %v2630_v1 }
 0xdfb   :  { %2375 = vmatpush3.bf16.msra.mxu1 %v2744_v10  ;;  %v728_v10 = vrot.slane %v632_v51, 6 }
 0xdfc   :  { %2384 = vmatprep.subr.bf16.mxu1 %v2630_v1 }
 0xec9   :  { %v712_v56 = vpop.f32.mrb[4].mxu1 }
 0xeca   :  { %v717_v57 = vrot.slane %v712_v56, 6  ;;  %v2195_v58 = vpop.f32.mrb[5].mxu1 }
 0xecb   :  { %v65_v58 = vld [vmem:[#allocation6 + $0x8] sm:$0xff] }
 0xecc   :  { %v719_v59 = vadd.f32 %v717_v57, %v2833_v38  ;;  %v64_v57 = vld [vmem:[#allocation6] sm:$0xff] }
 0xece   :  { %2490 = vtanh.f32 %v719_v59  ;;  %v2014_v61 = vmul.f32 -1.442695, %v719_v59  ;;  %v978_v59 = vld [vmem:[%s3027_s4 + $0x10] sm:$0xff] }
 0xed0   :  { %2492 = vpow2.f32 %v2014_v61  ;;  %v66_v61 = vld [vmem:[#allocation6 + $0x10] sm:$0xff] }
 0xed8   :  { %v2491_v60 = vpop.eup %2490 }
 0xed9   :  { %732 = vrot.lane.b32.xlu0 %v2491_v60, %s2634_s24  ;;  %v979_v60 = vld [vmem:[%s3027_s4 + $0x18] sm:$0xff] }
 0xeda   :  { %v2493_v7 = vpop.eup %2492 }
 0xedb   :  { %v723_v62 = vadd.f32 1.0, %v2493_v7  ;;  %v67_v7 = vld [vmem:[#allocation6 + $0x18] sm:$0xff] }
 0xedd   :  { %2494 = vrcp.f32 %v723_v62  ;;  %v2380_v62 = vpack.c.bf16 %v979_v60, %v978_v59 }
 0xee7   :  { %v2495_v63 = vpop.eup %2494 }
 0xee8   :  { %v730_v4 = vmul.f32 %v2495_v63, %v728_v10 }
 0xf4b   :  { %v733_v0 = vpop.permute.xlu0 %732 }
 0xf4c   :  { %v735_v3 = vmul.f32 %v2495_v63, %v733_v0 }
 0xf4e   :  { %737 = vrot.lane.b32.xlu1 %v735_v3, %s2635_s1 }
 0xfc0   :  { %v738_v5 = vpop.permute.xlu1 %737 }
 0xfc1   :  { %v740_v6 = vadd.f32 %v738_v5, %v730_v4 }
 0xfc3   :  { %2496 = vtanh.f32 %v740_v6  ;;  %v839_v29 = vrot.slane %v740_v6, 6 }
 0xfcd   :  { %v2497_v8 = vpop.eup %2496 }
 0xfce   :  { %743 = vrot.lane.b32.xlu0 %v2497_v8, %s2634_s24 }
0x1040   :  { %v744_v12 = vpop.permute.xlu0 %743 }
0x1041   :  { %v2852_v13 = vmul.f32 %v2495_v63, %v744_v12  ;;  %v2896_v63 = vpack.c.bf16 %v67_v7, %v66_v61 }
0x1043   :  { %v752_v16 = vrot.slane %v2852_v13, 2 }
0x1045   :  { %753 = vrot.lane.b32.xlu1 %v752_v16, %s2635_s1  ;;  %v2019_v16 = vld [vmem:[%s3029_s6] ss:$0 sm:$0xff] }
0x10b7   :  { %v754_v17 = vpop.permute.xlu1 %753 }
0x10b8   :  { %2205 = vmatmul.mubr.msk.f32.vlgmr.msra.gmra.mrb[6].mxu0 %vm98_vm2, %v754_v17 }
0x118b   :  { %v823_v18 = vpop.f32.mrb[6].mxu0 }
0x118c   :  { %v828_v19 = vrot.slane %v823_v18, 4  ;;  %v2206_v20 = vpop.f32.mrb[7].mxu0 }
0x118e   :  { %v830_v21 = vadd.f32 %v828_v19, %v2833_v38 }
0x1190   :  { %2498 = vtanh.f32 %v830_v21  ;;  %v2016_v23 = vmul.f32 -1.442695, %v830_v21 }
0x1192   :  { %2500 = vpow2.f32 %v2016_v23 }
0x119a   :  { %v2499_v22 = vpop.eup %2498 }
0x119b   :  { %843 = vrot.lane.b32.xlu0 %v2499_v22, %s2634_s24 }
0x119c   :  { %v2501_v24 = vpop.eup %2500 }
0x119d   :  { %v834_v25 = vadd.f32 1.0, %v2501_v24 }
0x119f   :  { %2502 = vrcp.f32 %v834_v25 }
0x11a9   :  { %v2503_v26 = vpop.eup %2502 }
0x11aa   :  { %v841_v30 = vmul.f32 %v2503_v26, %v839_v29 }
0x120d   :  { %v844_v27 = vpop.permute.xlu0 %843 }
0x120e   :  { %v846_v28 = vmul.f32 %v2503_v26, %v844_v27 }
0x1210   :  { %848 = vrot.lane.b32.xlu1 %v846_v28, %s2635_s1 }
0x1282   :  { %v849_v15 = vpop.permute.xlu1 %848 }
0x1283   :  { %v851_v31 = vadd.f32 %v849_v15, %v841_v30 }
0x1285   :  { %2504 = vtanh.f32 %v851_v31 }
0x128f   :  { %v2505_v32 = vpop.eup %2504 }
0x1290   :  { %854 = vrot.lane.b32.xlu0 %v2505_v32, %s2634_s24 }
0x1302   :  { %v855_v34 = vpop.permute.xlu0 %854 }
0x1303   :  { %v857_v35 = vmul.f32 %v2503_v26, %v855_v34 }
0x1305   :  { %v863_v36 = vrot.slane %v857_v35, 4 }
0x1307   :  { %864 = vrot.lane.b32.xlu1 %v863_v36, %s2635_s1 }
0x1379   :  { %v865_v37 = vpop.permute.xlu1 %864 }
0x137a   :  { %2216 = vmatmul.mubr.msk.f32.vlgmr.msra.gmra.mrb[6].mxu1 %vm98_vm2, %v865_v37 }
0x137b   :  { %2237 = vmatprep.mubr.msk.f32.mxu1 %vm2631_vm0, %v2632_v2 }
0x144d   :  { %v934_v39 = vpop.f32.mrb[6].mxu1 }
0x144e   :  { %v939_v40 = vrot.slane %v934_v39, 2  ;;  %v2217_v41 = vpop.f32.mrb[7].mxu1 }
0x1450   :  { %v941_v42 = vadd.f32 %v939_v40, %v2833_v38  ;;  %v950_v38 = vrot.slane %v851_v31, 6 }
0x1452   :  { %2506 = vtanh.f32 %v941_v42  ;;  %v2018_v44 = vmul.f32 -1.442695, %v941_v42 }
0x1454   :  { %2508 = vpow2.f32 %v2018_v44 }
0x145c   :  { %v2507_v43 = vpop.eup %2506 }
0x145d   :  { %954 = vrot.lane.b32.xlu0 %v2507_v43, %s2634_s24 }
0x145e   :  { %v2509_v45 = vpop.eup %2508 }
0x145f   :  { %v945_v46 = vadd.f32 1.0, %v2509_v45 }
0x1461   :  { %2510 = vrcp.f32 %v945_v46 }
0x146b   :  { %v2511_v47 = vpop.eup %2510 }
0x146c   :  { %v952_v14 = vmul.f32 %v2511_v47, %v950_v38 }
0x14cf   :  { %v955_v48 = vpop.permute.xlu0 %954 }
0x14d0   :  { %v957_v11 = vmul.f32 %v2511_v47, %v955_v48 }
0x14d2   :  { %959 = vrot.lane.b32.xlu1 %v957_v11, %s2635_s1 }
0x14d6   :  { %307 = vrot.lane.b32.xlu1 %v2788_v50, %s2635_s1 }
0x14da   :  { %531 = vrot.lane.b32.xlu1 %v2821_v33, %s2635_s1  ;;  %v976_v33 = vld [vmem:[%s3027_s4] sm:$0xff] }
0x14db   :  { %v2376_v56 = vpack.c.bf16 %v977_v55, %v976_v33 }
0x14dd   :  { %2377 = vmatprep.subr.bf16.mxu0 %v2376_v56 }
0x14de   :  { %859 = vrot.lane.b32.xlu1 %v857_v35, %s2635_s1  ;;  %2379 = vmatpush3.bf16.msra.mxu0 %v2376_v56 }
0x14df   :  { %2381 = vmatprep.subr.bf16.mxu0 %v2380_v62 }
0x14e2   :  { %2383 = vmatpush3.bf16.msra.mxu0 %v2380_v62 }
0x14e3   :  { %2390 = vmatprep.subr.bf16.mxu0 %v2630_v1 }
0x1544   :  { %v960_v49 = vpop.permute.xlu1 %959 }
0x1545   :  { %v962_v51 = vadd.f32 %v960_v49, %v952_v14 }
0x1547   :  { %2512 = vtanh.f32 %v962_v51 }
0x1548   :  { %v308_v52 = vpop.permute.xlu1 %307 }
0x1549   :  { %311 = vst.msk [vmem:[#allocation2] sm:$0xc] %vm310_vm3, %v308_v52 }
0x154c   :  { %v532_v53 = vpop.permute.xlu1 %531 }
0x154d   :  { %535 = vst.msk [vmem:[#allocation2] sm:$0xc0] %vm534_vm4, %v532_v53 }
0x1550   :  { %v860_v50 = vpop.permute.xlu1 %859 }
0x1551   :  { %v2513_v54 = vpop.eup %2512  ;;  %862 = vst.msk [vmem:[#allocation2 + $0x8] sm:$0x30] %vm422_vm5, %v860_v50 }
0x1552   :  { %965 = vrot.lane.b32.xlu0 %v2513_v54, %s2634_s24 }
0x1556   :  { %419 = vrot.lane.b32.xlu0 %v2803_v9, %s2635_s1  ;;  %v2890_v9 = vpack.c.bf16 %v65_v58, %v64_v57 }
0x1558   :  { %2386 = vmatpush3.bf16.msra.mxu1 %v2890_v9 }
0x1559   :  { %2387 = vmatprep.subr.bf16.mxu1 %v2630_v1 }
0x155a   :  { %748 = vrot.lane.b32.xlu0 %v2852_v13, %s2635_s1 }
0x155c   :  { %2389 = vmatpush3.bf16.msra.mxu1 %v2896_v63 }
0x155d   :  { %2396 = vmatprep.subr.bf16.mxu1 %v2630_v1 }
0x155f   :  { %2238 = vmatmul.mubr.f32.vlgmr.msra.gmra.mrb[8].mxu1 %v2632_v2 }
0x1560   :  { %2398 = vmatpush3.bf16.msra.mxu1 %v2890_v9  ;;  %2259 = vmatprep.mubr.msk.f32.mxu1 %vm2631_vm0, %v2632_v2 }
0x1561   :  { %2399 = vmatprep.subr.bf16.mxu1 %v2630_v1 }
0x1564   :  { %2401 = vmatpush3.bf16.msra.mxu1 %v2896_v63 }
0x1565   :  { %2408 = vmatprep.subr.bf16.mxu1 %v2630_v1 }
0x15c4   :  { %v966_v0 = vpop.permute.xlu0 %965 }
0x15c5   :  { %v968_v3 = vmul.f32 %v2511_v47, %v966_v0 }
0x15c7   :  { %970 = vrot.lane.b32.xlu0 %v968_v3, %s2635_s1 }
0x15c8   :  { %v420_v10 = vpop.permute.xlu0 %419 }
0x15c9   :  { %423 = vst.msk [vmem:[#allocation2] sm:$0x30] %vm422_vm5, %v420_v10 }
0x15cc   :  { %v749_v4 = vpop.permute.xlu0 %748 }
0x15cd   :  { %751 = vst.msk [vmem:[#allocation2 + $0x8] sm:$0xc] %vm310_vm3, %v749_v4 }
0x15d0   :  { %v974_v5 = vld [vmem:[#allocation2] sm:$0xff] }
0x15d1   :  { %2226 = vmatprep.mubr.msk.f32.mxu0 %vm98_vm2, %v974_v5 }
0x1632   :  { %v1134_v12 = vpop.f32.mrb[8].mxu1 }
0x1633   :  { %v2239_v13 = vpop.f32.mrb[9].mxu1 }
0x1639   :  { %v971_v6 = vpop.permute.xlu0 %970 }
0x163a   :  { %973 = vst.msk [vmem:[#allocation2 + $0x8] sm:$0xc0] %vm534_vm4, %v971_v6 }
0x1641   :  { %v975_v8 = vld [vmem:[#allocation2 + $0x8] sm:$0xff] }
0x1642   :  { %2227 = vmatmul.mubr.msk.f32.vlgmr.msra.gmra.mrb[8].mxu0 %vm98_vm2, %v975_v8 }
0x1643   :  { %2392 = vmatpush3.bf16.msra.mxu0 %v2890_v9  ;;  %2248 = vmatprep.mubr.msk.f32.mxu0 %vm2631_vm0, %v2632_v2 }
0x1644   :  { %2393 = vmatprep.subr.bf16.mxu0 %v2630_v1 }
0x1647   :  { %2395 = vmatpush3.bf16.msra.mxu0 %v2896_v63 }
0x1648   :  { %2402 = vmatprep.subr.bf16.mxu0 %v2630_v1 }
0x1715   :  { %v2228_v17 = vpop.f32.mrb[8].mxu0 }
0x1716   :  { %v2924_v18 = vadd.f32 %v2228_v17, %v2019_v16  ;;  %v1059_v19 = vpop.f32.mrb[9].mxu0 }
0x1717   :  { %v2926_v20 = vadd.f32 %v2019_v16, %v1059_v19 }
0x1719   :  { %v1138_v21 = vadd.f32 %v1134_v12, %v2926_v20 }
0x171b   :  { %2514 = vtanh.f32 %v1138_v21  ;;  %v2022_v23 = vmul.f32 -1.442695, %v1138_v21 }
0x171d   :  { %2516 = vpow2.f32 %v2022_v23 }
0x1725   :  { %v2515_v22 = vpop.eup %2514 }
0x1726   :  { %1148 = vrot.lane.b32.xlu1 %v2515_v22, %s2634_s24 }
0x1727   :  { %v2517_v24 = vpop.eup %2516 }
0x1728   :  { %v1142_v25 = vadd.f32 1.0, %v2517_v24 }
0x172a   :  { %2518 = vrcp.f32 %v1142_v25 }
0x1734   :  { %v2519_v26 = vpop.eup %2518 }
0x1735   :  { %v1146_v29 = vmul.f32 0.0, %v2519_v26 }
0x1798   :  { %v1149_v27 = vpop.permute.xlu1 %1148 }
0x1799   :  { %v1151_v28 = vmul.f32 %v2519_v26, %v1149_v27 }
0x179b   :  { %1153 = vrot.lane.b32.xlu0 %v1151_v28, %s2635_s1 }
0x180d   :  { %v1154_v30 = vpop.permute.xlu0 %1153 }
0x180e   :  { %v1156_v15 = vadd.f32 %v1154_v30, %v1146_v29 }
0x1810   :  { %2520 = vtanh.f32 %v1156_v15  ;;  %v1250_v48 = vrot.slane %v1156_v15, 6 }
0x181a   :  { %v2521_v31 = vpop.eup %2520 }
0x181b   :  { %1159 = vrot.lane.b32.xlu1 %v2521_v31, %s2634_s24 }
0x188d   :  { %v1160_v32 = vpop.permute.xlu1 %1159 }
0x188e   :  { %v1162_v34 = vmul.f32 %v2519_v26, %v1160_v32 }
0x1890   :  { %1164 = vrot.lane.b32.xlu0 %v1162_v34, %s2635_s1 }
0x1902   :  { %v1165_v35 = vpop.permute.xlu0 %1164 }
0x1903   :  { %2249 = vmatmul.mubr.msk.f32.vlgmr.msra.gmra.mrb[10].mxu0 %vm98_vm2, %v1165_v35 }
0x1904   :  { %2404 = vmatpush3.bf16.msra.mxu0 %v2890_v9  ;;  %2270 = vmatprep.mubr.msk.f32.mxu0 %vm2631_vm0, %v2632_v2 }
0x1905   :  { %2405 = vmatprep.subr.bf16.mxu0 %v2630_v1 }
0x1908   :  { %2407 = vmatpush3.bf16.msra.mxu0 %v2896_v63 }
0x1909   :  { %2414 = vmatprep.subr.bf16.mxu0 %v2630_v1 }
0x19d6   :  { %v1234_v36 = vpop.f32.mrb[10].mxu0 }
0x19d7   :  { %v1239_v37 = vrot.slane %v1234_v36, 6  ;;  %v2250_v39 = vpop.f32.mrb[11].mxu0 }
0x19d9   :  { %v1241_v40 = vadd.f32 %v1239_v37, %v2926_v20 }
0x19db   :  { %2522 = vtanh.f32 %v1241_v40  ;;  %v2024_v42 = vmul.f32 -1.442695, %v1241_v40 }
0x19dd   :  { %2524 = vpow2.f32 %v2024_v42 }
0x19e5   :  { %v2523_v41 = vpop.eup %2522 }
0x19e6   :  { %1254 = vrot.lane.b32.xlu1 %v2523_v41, %s2634_s24 }
0x19e7   :  { %v2525_v43 = vpop.eup %2524 }
0x19e8   :  { %v1245_v44 = vadd.f32 1.0, %v2525_v43 }
0x19ea   :  { %2526 = vrcp.f32 %v1245_v44 }
0x19f4   :  { %v2527_v45 = vpop.eup %2526 }
0x19f5   :  { %v1252_v11 = vmul.f32 %v2527_v45, %v1250_v48 }
0x1a58   :  { %v1255_v46 = vpop.permute.xlu1 %1254 }
0x1a59   :  { %v1257_v47 = vmul.f32 %v2527_v45, %v1255_v46 }
0x1a5b   :  { %1259 = vrot.lane.b32.xlu0 %v1257_v47, %s2635_s1 }
0x1acd   :  { %v1260_v38 = vpop.permute.xlu0 %1259 }
0x1ace   :  { %v1262_v14 = vadd.f32 %v1260_v38, %v1252_v11 }
0x1ad0   :  { %2528 = vtanh.f32 %v1262_v14  ;;  %v1357_v0 = vrot.slane %v1262_v14, 6 }
0x1ada   :  { %v2529_v49 = vpop.eup %2528 }
0x1adb   :  { %1265 = vrot.lane.b32.xlu1 %v2529_v49, %s2634_s24 }
0x1b4d   :  { %v1266_v51 = vpop.permute.xlu1 %1265 }
0x1b4e   :  { %v1268_v52 = vmul.f32 %v2527_v45, %v1266_v51 }
0x1b50   :  { %v1270_v53 = vrot.slane %v1268_v52, 2 }
0x1b52   :  { %1271 = vrot.lane.b32.xlu0 %v1270_v53, %s2635_s1 }
0x1bc4   :  { %v1272_v50 = vpop.permute.xlu0 %1271 }
0x1bc5   :  { %2260 = vmatmul.mubr.msk.f32.vlgmr.msra.gmra.mrb[10].mxu1 %vm98_vm2, %v1272_v50 }
0x1bc6   :  { %2410 = vmatpush3.bf16.msra.mxu1 %v2890_v9  ;;  %2281 = vmatprep.mubr.msk.f32.mxu1 %vm2631_vm0, %v2632_v2 }
0x1bc7   :  { %2411 = vmatprep.subr.bf16.mxu1 %v2630_v1 }
0x1bca   :  { %2413 = vmatpush3.bf16.msra.mxu1 %v2896_v63 }
0x1bcb   :  { %2420 = vmatprep.subr.bf16.mxu1 %v2630_v1 }
0x1c98   :  { %v1341_v54 = vpop.f32.mrb[10].mxu1 }
0x1c99   :  { %v1346_v33 = vrot.slane %v1341_v54, 4  ;;  %v2261_v55 = vpop.f32.mrb[11].mxu1 }
0x1c9b   :  { %v1348_v56 = vadd.f32 %v1346_v33, %v2926_v20 }
0x1c9d   :  { %2530 = vtanh.f32 %v1348_v56  ;;  %v2026_v58 = vmul.f32 -1.442695, %v1348_v56 }
0x1c9f   :  { %2532 = vpow2.f32 %v2026_v58 }
0x1ca7   :  { %v2531_v57 = vpop.eup %2530 }
0x1ca8   :  { %1361 = vrot.lane.b32.xlu1 %v2531_v57, %s2634_s24 }
0x1ca9   :  { %v2533_v59 = vpop.eup %2532 }
0x1caa   :  { %v1352_v60 = vadd.f32 1.0, %v2533_v59 }
0x1cac   :  { %2534 = vrcp.f32 %v1352_v60 }
0x1cb6   :  { %v2535_v61 = vpop.eup %2534 }
0x1cb7   :  { %v1359_v3 = vmul.f32 %v2535_v61, %v1357_v0 }
0x1d1a   :  { %v1362_v7 = vpop.permute.xlu1 %1361 }
0x1d1b   :  { %v1364_v62 = vmul.f32 %v2535_v61, %v1362_v7 }
0x1d1d   :  { %1366 = vrot.lane.b32.xlu0 %v1364_v62, %s2635_s1 }
0x1d8f   :  { %v1367_v10 = vpop.permute.xlu0 %1366 }
0x1d90   :  { %v1369_v4 = vadd.f32 %v1367_v10, %v1359_v3 }
0x1d92   :  { %2536 = vtanh.f32 %v1369_v4  ;;  %v1464_v29 = vrot.slane %v1369_v4, 6 }
0x1d9c   :  { %v2537_v5 = vpop.eup %2536 }
0x1d9d   :  { %1372 = vrot.lane.b32.xlu1 %v2537_v5, %s2634_s24 }
0x1e0f   :  { %v1373_v6 = vpop.permute.xlu1 %1372 }
0x1e10   :  { %v1375_v8 = vmul.f32 %v2535_v61, %v1373_v6 }
0x1e12   :  { %v1377_v12 = vrot.slane %v1375_v8, 4 }
0x1e14   :  { %1378 = vrot.lane.b32.xlu0 %v1377_v12, %s2635_s1 }
0x1e86   :  { %v1379_v13 = vpop.permute.xlu0 %1378 }
0x1e87   :  { %2271 = vmatmul.mubr.msk.f32.vlgmr.msra.gmra.mrb[12].mxu0 %vm98_vm2, %v1379_v13 }
0x1e88   :  { %2416 = vmatpush3.bf16.msra.mxu0 %v2890_v9  ;;  %2292 = vmatprep.mubr.msk.f32.mxu0 %vm2631_vm0, %v2632_v2 }
0x1e89   :  { %2417 = vmatprep.subr.bf16.mxu0 %v2630_v1 }
0x1e8c   :  { %2419 = vmatpush3.bf16.msra.mxu0 %v2896_v63 }
0x1e8d   :  { %2426 = vmatprep.subr.bf16.mxu0 %v2630_v1 }
0x1f5a   :  { %v1448_v16 = vpop.f32.mrb[12].mxu0 }
0x1f5b   :  { %v1453_v17 = vrot.slane %v1448_v16, 2  ;;  %v2272_v19 = vpop.f32.mrb[13].mxu0 }
0x1f5d   :  { %v1455_v21 = vadd.f32 %v1453_v17, %v2926_v20 }
0x1f5f   :  { %2538 = vtanh.f32 %v1455_v21  ;;  %v2028_v23 = vmul.f32 -1.442695, %v1455_v21 }
0x1f61   :  { %2540 = vpow2.f32 %v2028_v23 }
0x1f69   :  { %v2539_v22 = vpop.eup %2538 }
0x1f6a   :  { %1468 = vrot.lane.b32.xlu1 %v2539_v22, %s2634_s24 }
0x1f6b   :  { %v2541_v24 = vpop.eup %2540 }
0x1f6c   :  { %v1459_v25 = vadd.f32 1.0, %v2541_v24 }
0x1f6e   :  { %2542 = vrcp.f32 %v1459_v25 }
0x1f78   :  { %v2543_v26 = vpop.eup %2542 }
0x1f79   :  { %v1466_v30 = vmul.f32 %v2543_v26, %v1464_v29 }
0x1fdc   :  { %v1469_v27 = vpop.permute.xlu1 %1468 }
0x1fdd   :  { %v1471_v28 = vmul.f32 %v2543_v26, %v1469_v27 }
0x1fdf   :  { %1473 = vrot.lane.b32.xlu0 %v1471_v28, %s2635_s1 }
0x2051   :  { %v1474_v15 = vpop.permute.xlu0 %1473 }
0x2052   :  { %v1476_v31 = vadd.f32 %v1474_v15, %v1466_v30 }
0x2054   :  { %2544 = vtanh.f32 %v1476_v31  ;;  %v1568_v48 = vrot.slane %v1476_v31, 6 }
0x205e   :  { %v2545_v20 = vpop.eup %2544 }
0x205f   :  { %1479 = vrot.lane.b32.xlu1 %v2545_v20, %s2634_s24 }
0x20d1   :  { %v1480_v32 = vpop.permute.xlu1 %1479 }
0x20d2   :  { %v1482_v34 = vmul.f32 %v2543_v26, %v1480_v32 }
0x20d4   :  { %v1484_v35 = vrot.slane %v1482_v34, 6 }
0x20d6   :  { %1485 = vrot.lane.b32.xlu0 %v1484_v35, %s2635_s1 }
0x2148   :  { %v1486_v36 = vpop.permute.xlu0 %1485 }
0x2149   :  { %2282 = vmatmul.mubr.msk.f32.vlgmr.msra.gmra.mrb[12].mxu1 %vm98_vm2, %v1486_v36 }
0x214a   :  { %2422 = vmatpush3.bf16.msra.mxu1 %v2890_v9  ;;  %2303 = vmatprep.mubr.msk.f32.mxu1 %vm2631_vm0, %v2632_v2 }
0x214b   :  { %2423 = vmatprep.subr.bf16.mxu1 %v2630_v1 }
0x214e   :  { %2425 = vmatpush3.bf16.msra.mxu1 %v2896_v63 }
0x214f   :  { %2432 = vmatprep.subr.bf16.mxu1 %v2630_v1 }
0x221c   :  { %v1555_v37 = vpop.f32.mrb[12].mxu1 }
0x221d   :  { %v1559_v39 = vadd.f32 %v1555_v37, %v2924_v18  ;;  %v2283_v40 = vpop.f32.mrb[13].mxu1 }
0x221f   :  { %2546 = vtanh.f32 %v1559_v39  ;;  %v2030_v42 = vmul.f32 -1.442695, %v1559_v39 }
0x2221   :  { %2548 = vpow2.f32 %v2030_v42 }
0x2229   :  { %v2547_v41 = vpop.eup %2546 }
0x222a   :  { %1572 = vrot.lane.b32.xlu1 %v2547_v41, %s2634_s24 }
0x222b   :  { %v2549_v43 = vpop.eup %2548 }
0x222c   :  { %v1563_v44 = vadd.f32 1.0, %v2549_v43 }
0x222e   :  { %2550 = vrcp.f32 %v1563_v44 }
0x2238   :  { %v2551_v45 = vpop.eup %2550 }
0x2239   :  { %v1570_v11 = vmul.f32 %v2551_v45, %v1568_v48 }
0x229c   :  { %v1573_v46 = vpop.permute.xlu1 %1572 }
0x229d   :  { %v1575_v47 = vmul.f32 %v2551_v45, %v1573_v46 }
0x229f   :  { %1577 = vrot.lane.b32.xlu0 %v1575_v47, %s2635_s1 }
0x2311   :  { %v1578_v38 = vpop.permute.xlu0 %1577 }
0x2312   :  { %v1580_v14 = vadd.f32 %v1578_v38, %v1570_v11  ;;  %v1908_v11 = vld [vmem:[%s3030_s7 + $0x8] sm:$0xff]  ;;  %v1909_v38 = vld [vmem:[%s3030_s7 + $0x10] sm:$0xff] }
0x2314   :  { %2552 = vtanh.f32 %v1580_v14 }
0x231e   :  { %v2553_v49 = vpop.eup %2552 }
0x231f   :  { %1583 = vrot.lane.b32.xlu1 %v2553_v49, %s2634_s24  ;;  %v1910_v49 = vld [vmem:[%s3030_s7 + $0x18] sm:$0xff] }
0x2391   :  { %v1584_v51 = vpop.permute.xlu1 %1583 }
0x2392   :  { %v1586_v52 = vmul.f32 %v2551_v45, %v1584_v51  ;;  %v2436_v51 = vpack.c.bf16 %v1910_v49, %v1909_v38 }
0x2394   :  { %1588 = vrot.lane.b32.xlu0 %v1586_v52, %s2635_s1 }
0x2406   :  { %v1589_v53 = vpop.permute.xlu0 %1588 }
0x2407   :  { %2293 = vmatmul.mubr.msk.f32.vlgmr.msra.gmra.mrb[14].mxu0 %vm98_vm2, %v1589_v53 }
0x2408   :  { %2428 = vmatpush3.bf16.msra.mxu0 %v2890_v9  ;;  %2314 = vmatprep.mubr.msk.f32.mxu0 %vm2631_vm0, %v2632_v2 }
0x2409   :  { %2429 = vmatprep.subr.bf16.mxu0 %v2630_v1 }
0x240c   :  { %2431 = vmatpush3.bf16.msra.mxu0 %v2896_v63  ;;  %v1674_v63 = vrot.slane %v1580_v14, 6 }
0x24da   :  { %v1658_v50 = vpop.f32.mrb[14].mxu0 }
0x24db   :  { %v1663_v54 = vrot.slane %v1658_v50, 6  ;;  %v2294_v33 = vpop.f32.mrb[15].mxu0 }
0x24dd   :  { %v1665_v55 = vadd.f32 %v1663_v54, %v2924_v18 }
0x24df   :  { %2554 = vtanh.f32 %v1665_v55  ;;  %v2032_v57 = vmul.f32 -1.442695, %v1665_v55  ;;  %v2037_v55 = vld [vmem:[#allocation3] ss:$0 sm:$0xff] }
0x24e1   :  { %2556 = vpow2.f32 %v2032_v57 }
0x24e9   :  { %v2555_v56 = vpop.eup %2554 }
0x24ea   :  { %1678 = vrot.lane.b32.xlu1 %v2555_v56, %s2634_s24 }
0x24eb   :  { %v2557_v58 = vpop.eup %2556 }
0x24ec   :  { %v1669_v9 = vadd.f32 1.0, %v2557_v58 }
0x24ee   :  { %2558 = vrcp.f32 %v1669_v9 }
0x24f8   :  { %v2559_v59 = vpop.eup %2558 }
0x24f9   :  { %v1676_v7 = vmul.f32 %v2559_v59, %v1674_v63 }
0x255c   :  { %v1679_v60 = vpop.permute.xlu1 %1678 }
0x255d   :  { %v1681_v61 = vmul.f32 %v2559_v59, %v1679_v60 }
0x255f   :  { %1683 = vrot.lane.b32.xlu0 %v1681_v61, %s2635_s1 }
0x25d1   :  { %v1684_v62 = vpop.permute.xlu0 %1683 }
0x25d2   :  { %v1686_v0 = vadd.f32 %v1684_v62, %v1676_v7 }
0x25d4   :  { %2560 = vtanh.f32 %v1686_v0 }
0x25de   :  { %v2561_v3 = vpop.eup %2560 }
0x25df   :  { %1689 = vrot.lane.b32.xlu1 %v2561_v3, %s2634_s24 }
0x2651   :  { %v1690_v10 = vpop.permute.xlu1 %1689 }
0x2652   :  { %v1692_v4 = vmul.f32 %v2559_v59, %v1690_v10 }
0x2654   :  { %v1694_v5 = vrot.slane %v1692_v4, 2 }
0x2656   :  { %1695 = vrot.lane.b32.xlu0 %v1694_v5, %s2635_s1 }
0x26c8   :  { %v1696_v6 = vpop.permute.xlu0 %1695 }
0x26c9   :  { %2304 = vmatmul.mubr.msk.f32.vlgmr.msra.gmra.mrb[14].mxu1 %vm98_vm2, %v1696_v6 }
0x26ca   :  { %2325 = vmatprep.mubr.msk.f32.mxu1 %vm2631_vm0, %v2632_v2  ;;  %v1781_v2 = vrot.slane %v1686_v0, 6 }
0x279c   :  { %v1765_v8 = vpop.f32.mrb[14].mxu1 }
0x279d   :  { %v1770_v12 = vrot.slane %v1765_v8, 4  ;;  %v2305_v13 = vpop.f32.mrb[15].mxu1 }
0x279f   :  { %v1772_v16 = vadd.f32 %v1770_v12, %v2924_v18 }
0x27a1   :  { %2562 = vtanh.f32 %v1772_v16  ;;  %v2034_v19 = vmul.f32 -1.442695, %v1772_v16 }
0x27a3   :  { %2564 = vpow2.f32 %v2034_v19 }
0x27ab   :  { %v2563_v17 = vpop.eup %2562 }
0x27ac   :  { %1785 = vrot.lane.b32.xlu1 %v2563_v17, %s2634_s24 }
0x27ad   :  { %v2565_v21 = vpop.eup %2564 }
0x27ae   :  { %v1776_v22 = vadd.f32 1.0, %v2565_v21 }
0x27b0   :  { %2566 = vrcp.f32 %v1776_v22 }
0x27ba   :  { %v2567_v23 = vpop.eup %2566 }
0x27bb   :  { %v1783_v26 = vmul.f32 %v2567_v23, %v1781_v2 }
0x281e   :  { %v1786_v24 = vpop.permute.xlu1 %1785 }
0x281f   :  { %v1788_v25 = vmul.f32 %v2567_v23, %v1786_v24 }
0x2821   :  { %1790 = vrot.lane.b32.xlu0 %v1788_v25, %s2635_s1 }
0x2893   :  { %v1791_v27 = vpop.permute.xlu0 %1790 }
0x2894   :  { %v1793_v28 = vadd.f32 %v1791_v27, %v1783_v26 }
0x2896   :  { %2568 = vtanh.f32 %v1793_v28  ;;  %v1888_v45 = vrot.slane %v1793_v28, 6 }
0x28a0   :  { %v2569_v29 = vpop.eup %2568 }
0x28a1   :  { %1796 = vrot.lane.b32.xlu1 %v2569_v29, %s2634_s24 }
0x2913   :  { %v1797_v30 = vpop.permute.xlu1 %1796 }
0x2914   :  { %v1799_v15 = vmul.f32 %v2567_v23, %v1797_v30 }
0x2916   :  { %v1801_v31 = vrot.slane %v1799_v15, 4 }
0x2918   :  { %1802 = vrot.lane.b32.xlu0 %v1801_v31, %s2635_s1 }
0x298a   :  { %v1803_v20 = vpop.permute.xlu0 %1802 }
0x298b   :  { %2315 = vmatmul.mubr.msk.f32.vlgmr.msra.gmra.mrb[16].mxu0 %vm98_vm2, %v1803_v20 }
0x2a5e   :  { %v1872_v32 = vpop.f32.mrb[16].mxu0 }
0x2a5f   :  { %v1877_v34 = vrot.slane %v1872_v32, 2  ;;  %v2316_v35 = vpop.f32.mrb[17].mxu0 }
0x2a61   :  { %v1879_v36 = vadd.f32 %v1877_v34, %v2924_v18  ;;  %v1907_v18 = vld [vmem:[%s3030_s7] sm:$0xff] }
0x2a62   :  { %v2433_v14 = vpack.c.bf16 %v1908_v11, %v1907_v18 }
0x2a63   :  { %2570 = vtanh.f32 %v1879_v36  ;;  %v2036_v39 = vmul.f32 -1.442695, %v1879_v36 }
0x2a64   :  { %2434 = vmatpush3.bf16.msra.mxu1 %v2433_v14 }
0x2a65   :  { %2572 = vpow2.f32 %v2036_v39  ;;  %2435 = vmatprep.subr.bf16.mxu1 %v2630_v1 }
0x2a68   :  { %2437 = vmatpush3.bf16.msra.mxu1 %v2436_v51 }
0x2a6d   :  { %v2571_v37 = vpop.eup %2570 }
0x2a6e   :  { %1892 = vrot.lane.b32.xlu1 %v2571_v37, %s2634_s24 }
0x2a6f   :  { %v2573_v40 = vpop.eup %2572 }
0x2a70   :  { %v1883_v41 = vadd.f32 1.0, %v2573_v40 }
0x2a72   :  { %2574 = vrcp.f32 %v1883_v41 }
0x2a7c   :  { %v2575_v42 = vpop.eup %2574 }
0x2a7d   :  { %v1890_v46 = vmul.f32 %v2575_v42, %v1888_v45 }
0x2ae0   :  { %v1893_v43 = vpop.permute.xlu1 %1892 }
0x2ae1   :  { %v1895_v44 = vmul.f32 %v2575_v42, %v1893_v43 }
0x2ae3   :  { %1897 = vrot.lane.b32.xlu0 %v1895_v44, %s2635_s1 }
0x2b55   :  { %v1898_v47 = vpop.permute.xlu0 %1897 }
0x2b56   :  { %v1900_v48 = vadd.f32 %v1898_v47, %v1890_v46 }
0x2b58   :  { %2576 = vtanh.f32 %v1900_v48 }
0x2b62   :  { %v2577_v52 = vpop.eup %2576 }
0x2b63   :  { %1903 = vrot.lane.b32.xlu1 %v2577_v52, %s2634_s24 }
0x2bd5   :  { %v1904_v53 = vpop.permute.xlu1 %1903 }
0x2bd6   :  { %v1906_v50 = vmul.f32 %v2575_v42, %v1904_v53 }
0x2bd8   :  { %v1919_v54 = vrot.slane %v1906_v50, 6 }
0x2bda   :  { %1920 = vrot.lane.b32.xlu0 %v1919_v54, %s2635_s1 }
0x2c4c   :  { %v1921_v33 = vpop.permute.xlu0 %1920 }
0x2c4d   :  { %2326 = vmatmul.mubr.msk.f32.vlgmr.msra.gmra.mrb[16].mxu1 %vm98_vm2, %v1921_v33 }
0x2d20   :  { %v1990_v56 = vpop.f32.mrb[16].mxu1 }
0x2d21   :  { %v1991_v57 = vadd.f32 %v2037_v55, %v1990_v56  ;;  %v2327_v58 = vpop.f32.mrb[17].mxu1 }
0x2d23   :  { %1995 = vst.msk [vmem:[%s3032_s9] sm:$0x3] %vm1994_vm6, %v1991_v57 }
0x2d24   :  { %2000 = vsyncpa [#allocation5], 1 }
0x2d25   :  { %2001 = vsyncpa [#allocation7], 1 }

</bundles_post_ra>
